<compile_context>
chip_gen: v6e
topology: v6e:2x2x1
jax: 0.10.0
libtpu: 0.0.40
codegen_flags: <defaults>
</compile_context>

<pallas_src>
import jax
import jax.numpy as jnp
from jax.experimental import pallas as pl
from jax.experimental.pallas import tpu as pltpu

_EPS = 1e-5
_NEG = float(jnp.finfo(jnp.float32).min)   # maxpool padding value


# ------------------------------ Pallas kernel -------------------------------

def _inception_kernel(x_ref, xpad_ref,
                      b135_ref, s135_ref,
                      bc_ref, s23_ref,
                      b4_ref, s4_ref,
                      o1_ref, o23_ref, o4_ref,
                      padc_ref):
    h = o1_ref.shape[1]
    wc1 = o1_ref.shape[2]                        # W * oneByOne   (128)
    wcin = x_ref.shape[2]                        # W * Cin        (64)
    cin = (xpad_ref.shape[2] - wcin) // 2        # Cin
    kk = bc_ref.shape[0]                         # 5 (combined 3x3/5x5 taps)
    pad = (padc_ref.shape[0] - h) // 2           # 2

    # ---- fused 1x1 convs on x: [1x1 branch | 3x3 reduce | 5x5 reduce] ------
    x_rows = x_ref[0]                                           # (H, W*Cin)
    y = jnp.dot(x_rows, b135_ref[...], preferred_element_type=jnp.float32)
    y = jnp.maximum(y + s135_ref[...], 0.0)                     # (H, 256)
    o1_ref[0] = y[:, :wc1]                                      # lane-aligned

    # Reduce slab -> zero-padded VMEM scratch.  Boundary rows are re-zeroed
    # every step (cheap, and safe when the batch grid is split across cores).
    zrow = jnp.zeros((pad, padc_ref.shape[1]), jnp.float32)
    padc_ref[0:pad, :] = zrow
    padc_ref[pad + h:, :] = zrow
    padc_ref[pad:pad + h, :] = y[:, wc1:]                       # (H, 128)

    # ---- fused 3x3 + 5x5 convs over the combined reduce slab ---------------
    acc = jnp.zeros((h, o23_ref.shape[2]), jnp.float32)
    for dh in range(kk):
        acc = acc + jnp.dot(padc_ref[dh:dh + h, :], bc_ref[dh],
                            preferred_element_type=jnp.float32)
    o23_ref[0] = jnp.maximum(acc + s23_ref[...], 0.0)           # (H, 256)

    # ---- branch 4: separable 3x3/s1/p1 maxpool -> 1x1 conv -----------------
    xp = xpad_ref[0]                             # (H+2, (W+2)*Cin), -inf pad
    hmax = xp[:, 0:wcin]
    for dw in range(1, 3):
        hmax = jnp.maximum(hmax, xp[:, dw * cin:dw * cin + wcin])
    pooled = hmax[0:h, :]
    for dh in range(1, 3):
        pooled = jnp.maximum(pooled, hmax[dh:dh + h, :])
    o4_ref[0] = jnp.maximum(
        jnp.dot(pooled, b4_ref[...], preferred_element_type=jnp.float32)
        + s4_ref[...], 0.0)


# ------------------------------ JAX wrapper ---------------------------------

def _fold_bn(p, eps=_EPS):
    """Fold conv bias + inference BatchNorm into (scaled weights, shift)."""
    inv = p['gamma'] / jnp.sqrt(p['var'] + eps)
    w = p['w'] * inv[:, None, None, None]            # (Co, Ci, k, k)
    shift = p['beta'] + (p['b'] - p['mean']) * inv   # (Co,)
    return w, shift


def _band_weights(w, width):
    """(Co,Ci,k,k) conv weights -> (k, width*Ci, width*Co) banded matrices.

    B[dh, w_in*Ci+ci, w_out*Co+co] = w[co, ci, dh, w_in - w_out + k//2]
    (zero when the tap is outside the kernel / spatial range), so conv output
    row h is  sum_dh  x_padH[h + dh, :] @ B[dh].
    """
    co, ci, k, _ = w.shape
    p = k // 2
    w_in = jnp.arange(width)[:, None, None]
    w_out = jnp.arange(width)[None, :, None]
    dw = jnp.arange(k)[None, None, :]
    onehot = (w_in + p == w_out + dw).astype(w.dtype)          # (W, W, k)
    wperm = jnp.transpose(w, (2, 3, 1, 0))                     # (dh, dw, Ci, Co)
    band = jnp.einsum('aok,hkic->haioc', onehot, wperm)        # (k, W, Ci, W, Co)
    return band.reshape(k, width * ci, width * co)


def _row_shift(shift, width):
    return jnp.tile(shift, width)[None, :]                     # (1, width*Co)


def inception_forward(x_nchw, params):
    n, cin, h, w = x_nchw.shape
    one = params['inc1']['w'].shape[0]
    tred = params['inc2a']['w'].shape[0]
    three = params['inc2b']['w'].shape[0]
    fred = params['inc3a']['w'].shape[0]
    five = params['inc3b']['w'].shape[0]
    pproj = params['inc4b']['w'].shape[0]

    # NHWC lane-dense views: unpadded (convs) and -inf padded (maxpool).
    x_nhwc = jnp.transpose(x_nchw, (0, 2, 3, 1))
    x_rows = x_nhwc.reshape(n, h, w * cin)
    xpad = jnp.pad(x_nhwc, ((0, 0), (1, 1), (1, 1), (0, 0)),
                   constant_values=_NEG)
    xpad_rows = xpad.reshape(n, h + 2, (w + 2) * cin)

    # Folded + banded weights (tiny; BN scale folded into the weights).
    w1, s1 = _fold_bn(params['inc1'])
    w2a, s2a = _fold_bn(params['inc2a'])
    w2b, s2b = _fold_bn(params['inc2b'])
    w3a, s3a = _fold_bn(params['inc3a'])
    w3b, s3b = _fold_bn(params['inc3b'])
    w4, s4 = _fold_bn(params['inc4b'])

    b1 = _band_weights(w1, w)[0]           # (W*Cin, W*one)
    b2a = _band_weights(w2a, w)[0]         # (W*Cin, W*tred)
    b2b = _band_weights(w2b, w)            # (3, W*tred, W*three)
    b3a = _band_weights(w3a, w)[0]         # (W*Cin, W*fred)
    b3b = _band_weights(w3b, w)            # (5, W*fred, W*five)
    b4 = _band_weights(w4, w)[0]           # (W*Cin, W*pproj)

    # Fused 1x1-on-x weights / shifts: output lanes [o1 | r3 | r5].
    b135 = jnp.concatenate([b1, b2a, b3a], axis=1)
    s135 = jnp.concatenate(
        [_row_shift(s1, w), _row_shift(s2a, w), _row_shift(s3a, w)], axis=1)

    # Fused 3x3+5x5 banded weights over a 5-tap window of the combined
    # (pad-2) reduce slab: K rows [0:W*tred]=r3, [W*tred:]=r5;
    # N cols [0:W*three]=3x3 output, [W*three:]=5x5 output.
    wct, wcf = w * tred, w * fred
    wc3, wc5 = w * three, w * five
    bc = jnp.zeros((5, wct + wcf, wc3 + wc5), jnp.float32)
    bc = bc.at[1:4, 0:wct, 0:wc3].set(b2b)          # 3x3 taps sit at dh=1..3
    bc = bc.at[0:5, wct:, wc3:].set(b3b)
    s23 = jnp.concatenate([_row_shift(s2b, w), _row_shift(s3b, w)], axis=1)

    s4r = _row_shift(s4, w)

    full2 = lambda a: pl.BlockSpec(a.shape, lambda i: (0, 0))
    full3 = lambda a: pl.BlockSpec(a.shape, lambda i: (0, 0, 0))
    img = lambda shape: pl.BlockSpec(shape, lambda i: (i, 0, 0))

    grid_spec = pltpu.PrefetchScalarGridSpec(
        num_scalar_prefetch=0,
        grid=(n,),
        in_specs=[
            img((1, h, w * cin)),
            img((1, h + 2, (w + 2) * cin)),
            full2(b135), full2(s135),
            full3(bc), full2(s23),
            full2(b4), full2(s4r),
        ],
        out_specs=[
            img((1, h, w * one)),
            img((1, h, wc3 + wc5)),
            img((1, h, w * pproj)),
        ],
        scratch_shapes=[
            pltpu.VMEM((h + 4, wct + wcf), jnp.float32),   # padded reduce slab
        ],
    )
    o1, o23, o4 = pl.pallas_call(
        _inception_kernel,
        out_shape=(
            jax.ShapeDtypeStruct((n, h, w * one), jnp.float32),
            jax.ShapeDtypeStruct((n, h, wc3 + wc5), jnp.float32),
            jax.ShapeDtypeStruct((n, h, w * pproj), jnp.float32),
        ),
        grid_spec=grid_spec,
        compiler_params=pltpu.CompilerParams(
            dimension_semantics=("parallel",),
            vmem_limit_bytes=32 * 1024 * 1024,
        ),
    )(x_rows, xpad_rows, b135, s135, bc, s23, b4, s4r)

    out = jnp.concatenate(
        [o1.reshape(n, h, w, one),
         o23[:, :, :wc3].reshape(n, h, w, three),
         o23[:, :, wc3:].reshape(n, h, w, five),
         o4.reshape(n, h, w, pproj)], axis=-1)
    return jnp.transpose(out, (0, 3, 1, 2))          # back to NCHW


# ------------------------- pure-JAX reference (check) ------------------------

def _ref_conv_bn_relu(x_nhwc, p, eps=_EPS):
    w_hwio = jnp.transpose(p['w'], (2, 3, 1, 0))
    y = jax.lax.conv_general_dilated(
        x_nhwc, w_hwio, window_strides=(1, 1), padding='SAME',
        dimension_numbers=('NHWC', 'HWIO', 'NHWC'),
        precision=jax.lax.Precision.HIGHEST)
    inv = p['gamma'] / jnp.sqrt(p['var'] + eps)
    y = (y + p['b'] - p['mean']) * inv + p['beta']
    return jnp.maximum(y, 0.0)


def inception_reference(x_nchw, params):
    x = jnp.transpose(x_nchw, (0, 2, 3, 1))
    o1 = _ref_conv_bn_relu(x, params['inc1'])
    o2 = _ref_conv_bn_relu(_ref_conv_bn_relu(x, params['inc2a']), params['inc2b'])
    o3 = _ref_conv_bn_relu(_ref_conv_bn_relu(x, params['inc3a']), params['inc3b'])
    pooled = jax.lax.reduce_window(x, -jnp.inf, jax.lax.max,
                                   (1, 3, 3, 1), (1, 1, 1, 1), 'SAME')
    o4 = _ref_conv_bn_relu(pooled, params['inc4b'])
    out = jnp.concatenate([o1, o2, o3, o4], axis=-1)
    return jnp.transpose(out, (0, 3, 1, 2))


# ------------------------------------ main -----------------------------------

def init_conv_bn(key, cin, cout, k):
    kw, kb, kg, kbe, km, kv = jax.random.split(key, 6)
    return dict(
        w=0.1 * jax.random.normal(kw, (cout, cin, k, k), jnp.float32),
        b=0.1 * jax.random.normal(kb, (cout,), jnp.float32),
        gamma=1.0 + 0.1 * jax.random.normal(kg, (cout,), jnp.float32),
        beta=0.1 * jax.random.normal(kbe, (cout,), jnp.float32),
        mean=0.1 * jax.random.normal(km, (cout,), jnp.float32),
        var=1.0 + 0.1 * jnp.abs(jax.random.normal(kv, (cout,), jnp.float32)),
    )


if __name__ == "__main__":
    key = jax.random.PRNGKey(0)
    k_x, k1, k2a, k2b, k3a, k3b, k4b = jax.random.split(key, 7)

    # inception(inDepth=4, oneByOne=8, threeReduce=4, threeByThree=8,
    #           fiveReduce=4, fiveByFive=8, poolProj=8)
    N, CIN, H, W = 2, 4, 16, 16
    ONE, TRED, THREE, FRED, FIVE, PPROJ = 8, 4, 8, 4, 8, 8

    x = jax.random.normal(k_x, (N, CIN, H, W), jnp.float32)
    params = {
        'inc1':  init_conv_bn(k1,  CIN,  ONE,   1),
        'inc2a': init_conv_bn(k2a, CIN,  TRED,  1),
        'inc2b': init_conv_bn(k2b, TRED, THREE, 3),
        'inc3a': init_conv_bn(k3a, CIN,  FRED,  1),
        'inc3b': init_conv_bn(k3b, FRED, FIVE,  5),
        'inc4b': init_conv_bn(k4b, CIN,  PPROJ, 1),
    }

    out = jax.jit(inception_forward)(x, params)
    out = jax.block_until_ready(out)
    assert out.shape == (N, ONE + THREE + FIVE + PPROJ, H, W), out.shape
    assert out.dtype == jnp.float32

    ref = jax.block_until_ready(jax.jit(inception_reference)(x, params))
    max_err = float(jnp.max(jnp.abs(out - ref)))
    # tolerant of MXU f32 matmul precision modes; real layout bugs are O(0.1+)
    assert max_err < 3e-2, f"max |pallas - reference| = {max_err}"
    print("KERNEL_OK")
</pallas_src>

<mosaic_0001>
module attributes {stable_mosaic.version = 11 : i64} {
  func.func @_inception_kernel(%arg0: i32, %arg1: memref<1x16x64xf32, #tpu.memory_space<vmem>>, %arg2: memref<1x18x72xf32, #tpu.memory_space<vmem>>, %arg3: memref<64x256xf32, #tpu.memory_space<vmem>>, %arg4: memref<1x256xf32, #tpu.memory_space<vmem>>, %arg5: memref<5x128x256xf32, #tpu.memory_space<vmem>>, %arg6: memref<1x256xf32, #tpu.memory_space<vmem>>, %arg7: memref<64x128xf32, #tpu.memory_space<vmem>>, %arg8: memref<1x128xf32, #tpu.memory_space<vmem>>, %arg9: memref<1x16x128xf32, #tpu.memory_space<vmem>>, %arg10: memref<1x16x256xf32, #tpu.memory_space<vmem>>, %arg11: memref<1x16x128xf32, #tpu.memory_space<vmem>>, %arg12: memref<20x128xf32, #tpu.memory_space<vmem>>) attributes {dimension_semantics = [#tpu.dimension_semantics<parallel>], iteration_bounds = array<i64: 2>, scalar_prefetch = 0 : i64, scratch_operands = 1 : i64, tpu.core_type = #tpu.core_type<tc>, window_params = [{transform_indices = @transform_0, window_bounds = array<i64: 1, 16, 64>}, {transform_indices = @transform_1, window_bounds = array<i64: 1, 18, 72>}, {pipeline_mode = #tpu.pipeline_mode<synchronous>, transform_indices = @transform_2, window_bounds = array<i64: 64, 256>}, {pipeline_mode = #tpu.pipeline_mode<synchronous>, transform_indices = @transform_3, window_bounds = array<i64: 1, 256>}, {pipeline_mode = #tpu.pipeline_mode<synchronous>, transform_indices = @transform_4, window_bounds = array<i64: 5, 128, 256>}, {pipeline_mode = #tpu.pipeline_mode<synchronous>, transform_indices = @transform_5, window_bounds = array<i64: 1, 256>}, {pipeline_mode = #tpu.pipeline_mode<synchronous>, transform_indices = @transform_6, window_bounds = array<i64: 64, 128>}, {pipeline_mode = #tpu.pipeline_mode<synchronous>, transform_indices = @transform_7, window_bounds = array<i64: 1, 128>}, {transform_indices = @transform_8, window_bounds = array<i64: 1, 16, 128>}, {transform_indices = @transform_9, window_bounds = array<i64: 1, 16, 256>}, {transform_indices = @transform_10, window_bounds = array<i64: 1, 16, 128>}]} {
    %c0 = arith.constant 0 : index
    %c0_0 = arith.constant 0 : index
    %c0_1 = arith.constant 0 : index
    %0 = vector.load %arg1[%c0, %c0_0, %c0_1] : memref<1x16x64xf32, #tpu.memory_space<vmem>>, vector<1x16x64xf32>
    %1 = vector.shape_cast %0 : vector<1x16x64xf32> to vector<16x64xf32>
    %c0_2 = arith.constant 0 : index
    %c0_3 = arith.constant 0 : index
    %2 = vector.load %arg3[%c0_2, %c0_3] : memref<64x256xf32, #tpu.memory_space<vmem>>, vector<64x256xf32>
    %cst = arith.constant dense<0.000000e+00> : vector<16x256xf32>
    %3 = tpu.matmul %1, %2, %cst {dimension_numbers = #tpu.dot_dimension_numbers<[1], [0], [0], [1], [0, 0, 1, 1], [], []>} : vector<16x64xf32>, vector<64x256xf32>, vector<16x256xf32> -> vector<16x256xf32>
    %c0_4 = arith.constant 0 : index
    %c0_5 = arith.constant 0 : index
    %4 = vector.load %arg4[%c0_4, %c0_5] : memref<1x256xf32, #tpu.memory_space<vmem>>, vector<1x256xf32>
    %5 = vector.broadcast %4 : vector<1x256xf32> to vector<16x256xf32>
    %6 = arith.addf %3, %5 : vector<16x256xf32>
    %cst_6 = arith.constant 0.000000e+00 : f32
    %7 = vector.broadcast %cst_6 : f32 to vector<16x256xf32>
    %8 = arith.maximumf %6, %7 : vector<16x256xf32>
    %9 = vector.extract_strided_slice %8 {offsets = [0, 0], sizes = [16, 128], strides = [1, 1]} : vector<16x256xf32> to vector<16x128xf32>
    %c0_7 = arith.constant 0 : index
    %c0_8 = arith.constant 0 : index
    %c0_9 = arith.constant 0 : index
    %10 = vector.load %arg9[%c0_7, %c0_8, %c0_9] : memref<1x16x128xf32, #tpu.memory_space<vmem>>, vector<1x16x128xf32>
    %11 = vector.shape_cast %10 : vector<1x16x128xf32> to vector<16x128xf32>
    %12 = vector.shape_cast %9 : vector<16x128xf32> to vector<1x16x128xf32>
    tpu.vector_store %arg9[%c0_7, %c0_8, %c0_9], %12 {strides = array<i32>} : memref<1x16x128xf32, #tpu.memory_space<vmem>>, vector<1x16x128xf32>,
    %cst_10 = arith.constant 0.000000e+00 : f32
    %13 = vector.broadcast %cst_10 : f32 to vector<2x128xf32>
    %c0_11 = arith.constant 0 : index
    %c0_12 = arith.constant 0 : index
    %14 = vector.load %arg12[%c0_11, %c0_12] : memref<20x128xf32, #tpu.memory_space<vmem>>, vector<2x128xf32>
    tpu.vector_store %arg12[%c0_11, %c0_12], %13 {strides = array<i32>} : memref<20x128xf32, #tpu.memory_space<vmem>>, vector<2x128xf32>,
    %c18 = arith.constant 18 : index
    %c0_13 = arith.constant 0 : index
    %15 = vector.load %arg12[%c18, %c0_13] : memref<20x128xf32, #tpu.memory_space<vmem>>, vector<2x128xf32>
    tpu.vector_store %arg12[%c18, %c0_13], %13 {strides = array<i32>} : memref<20x128xf32, #tpu.memory_space<vmem>>, vector<2x128xf32>,
    %16 = vector.extract_strided_slice %8 {offsets = [0, 128], sizes = [16, 128], strides = [1, 1]} : vector<16x256xf32> to vector<16x128xf32>
    %c2 = arith.constant 2 : index
    %c0_14 = arith.constant 0 : index
    %17 = vector.load %arg12[%c2, %c0_14] : memref<20x128xf32, #tpu.memory_space<vmem>>, vector<16x128xf32>
    tpu.vector_store %arg12[%c2, %c0_14], %16 {strides = array<i32>} : memref<20x128xf32, #tpu.memory_space<vmem>>, vector<16x128xf32>,
    %cst_15 = arith.constant 0.000000e+00 : f32
    %18 = vector.broadcast %cst_15 : f32 to vector<16x256xf32>
    %c0_16 = arith.constant 0 : index
    %c0_17 = arith.constant 0 : index
    %19 = vector.load %arg12[%c0_16, %c0_17] : memref<20x128xf32, #tpu.memory_space<vmem>>, vector<16x128xf32>
    %c0_18 = arith.constant 0 : index
    %c0_19 = arith.constant 0 : index
    %c0_20 = arith.constant 0 : index
    %20 = vector.load %arg5[%c0_18, %c0_19, %c0_20] : memref<5x128x256xf32, #tpu.memory_space<vmem>>, vector<1x128x256xf32>
    %21 = vector.shape_cast %20 : vector<1x128x256xf32> to vector<128x256xf32>
    %cst_21 = arith.constant dense<0.000000e+00> : vector<16x256xf32>
    %22 = tpu.matmul %19, %21, %cst_21 {dimension_numbers = #tpu.dot_dimension_numbers<[1], [0], [0], [1], [0, 0, 1, 1], [], []>} : vector<16x128xf32>, vector<128x256xf32>, vector<16x256xf32> -> vector<16x256xf32>
    %23 = arith.addf %18, %22 : vector<16x256xf32>
    %c1 = arith.constant 1 : index
    %c0_22 = arith.constant 0 : index
    %24 = vector.load %arg12[%c1, %c0_22] : memref<20x128xf32, #tpu.memory_space<vmem>>, vector<16x128xf32>
    %c1_23 = arith.constant 1 : index
    %c0_24 = arith.constant 0 : index
    %c0_25 = arith.constant 0 : index
    %25 = vector.load %arg5[%c1_23, %c0_24, %c0_25] : memref<5x128x256xf32, #tpu.memory_space<vmem>>, vector<1x128x256xf32>
    %26 = vector.shape_cast %25 : vector<1x128x256xf32> to vector<128x256xf32>
    %cst_26 = arith.constant dense<0.000000e+00> : vector<16x256xf32>
    %27 = tpu.matmul %24, %26, %cst_26 {dimension_numbers = #tpu.dot_dimension_numbers<[1], [0], [0], [1], [0, 0, 1, 1], [], []>} : vector<16x128xf32>, vector<128x256xf32>, vector<16x256xf32> -> vector<16x256xf32>
    %28 = arith.addf %23, %27 : vector<16x256xf32>
    %c2_27 = arith.constant 2 : index
    %c0_28 = arith.constant 0 : index
    %29 = vector.load %arg12[%c2_27, %c0_28] : memref<20x128xf32, #tpu.memory_space<vmem>>, vector<16x128xf32>
    %c2_29 = arith.constant 2 : index
    %c0_30 = arith.constant 0 : index
    %c0_31 = arith.constant 0 : index
    %30 = vector.load %arg5[%c2_29, %c0_30, %c0_31] : memref<5x128x256xf32, #tpu.memory_space<vmem>>, vector<1x128x256xf32>
    %31 = vector.shape_cast %30 : vector<1x128x256xf32> to vector<128x256xf32>
    %cst_32 = arith.constant dense<0.000000e+00> : vector<16x256xf32>
    %32 = tpu.matmul %29, %31, %cst_32 {dimension_numbers = #tpu.dot_dimension_numbers<[1], [0], [0], [1], [0, 0, 1, 1], [], []>} : vector<16x128xf32>, vector<128x256xf32>, vector<16x256xf32> -> vector<16x256xf32>
    %33 = arith.addf %28, %32 : vector<16x256xf32>
    %c3 = arith.constant 3 : index
    %c0_33 = arith.constant 0 : index
    %34 = vector.load %arg12[%c3, %c0_33] : memref<20x128xf32, #tpu.memory_space<vmem>>, vector<16x128xf32>
    %c3_34 = arith.constant 3 : index
    %c0_35 = arith.constant 0 : index
    %c0_36 = arith.constant 0 : index
    %35 = vector.load %arg5[%c3_34, %c0_35, %c0_36] : memref<5x128x256xf32, #tpu.memory_space<vmem>>, vector<1x128x256xf32>
    %36 = vector.shape_cast %35 : vector<1x128x256xf32> to vector<128x256xf32>
    %cst_37 = arith.constant dense<0.000000e+00> : vector<16x256xf32>
    %37 = tpu.matmul %34, %36, %cst_37 {dimension_numbers = #tpu.dot_dimension_numbers<[1], [0], [0], [1], [0, 0, 1, 1], [], []>} : vector<16x128xf32>, vector<128x256xf32>, vector<16x256xf32> -> vector<16x256xf32>
    %38 = arith.addf %33, %37 : vector<16x256xf32>
    %c4 = arith.constant 4 : index
    %c0_38 = arith.constant 0 : index
    %39 = vector.load %arg12[%c4, %c0_38] : memref<20x128xf32, #tpu.memory_space<vmem>>, vector<16x128xf32>
    %c4_39 = arith.constant 4 : index
    %c0_40 = arith.constant 0 : index
    %c0_41 = arith.constant 0 : index
    %40 = vector.load %arg5[%c4_39, %c0_40, %c0_41] : memref<5x128x256xf32, #tpu.memory_space<vmem>>, vector<1x128x256xf32>
    %41 = vector.shape_cast %40 : vector<1x128x256xf32> to vector<128x256xf32>
    %cst_42 = arith.constant dense<0.000000e+00> : vector<16x256xf32>
    %42 = tpu.matmul %39, %41, %cst_42 {dimension_numbers = #tpu.dot_dimension_numbers<[1], [0], [0], [1], [0, 0, 1, 1], [], []>} : vector<16x128xf32>, vector<128x256xf32>, vector<16x256xf32> -> vector<16x256xf32>
    %43 = arith.addf %38, %42 : vector<16x256xf32>
    %c0_43 = arith.constant 0 : index
    %c0_44 = arith.constant 0 : index
    %44 = vector.load %arg6[%c0_43, %c0_44] : memref<1x256xf32, #tpu.memory_space<vmem>>, vector<1x256xf32>
    %45 = vector.broadcast %44 : vector<1x256xf32> to vector<16x256xf32>
    %46 = arith.addf %43, %45 : vector<16x256xf32>
    %cst_45 = arith.constant 0.000000e+00 : f32
    %47 = vector.broadcast %cst_45 : f32 to vector<16x256xf32>
    %48 = arith.maximumf %46, %47 : vector<16x256xf32>
    %c0_46 = arith.constant 0 : index
    %c0_47 = arith.constant 0 : index
    %c0_48 = arith.constant 0 : index
    %49 = vector.load %arg10[%c0_46, %c0_47, %c0_48] : memref<1x16x256xf32, #tpu.memory_space<vmem>>, vector<1x16x256xf32>
    %50 = vector.shape_cast %49 : vector<1x16x256xf32> to vector<16x256xf32>
    %51 = vector.shape_cast %48 : vector<16x256xf32> to vector<1x16x256xf32>
    tpu.vector_store %arg10[%c0_46, %c0_47, %c0_48], %51 {strides = array<i32>} : memref<1x16x256xf32, #tpu.memory_space<vmem>>, vector<1x16x256xf32>,
    %c0_49 = arith.constant 0 : index
    %c0_50 = arith.constant 0 : index
    %c0_51 = arith.constant 0 : index
    %52 = vector.load %arg2[%c0_49, %c0_50, %c0_51] : memref<1x18x72xf32, #tpu.memory_space<vmem>>, vector<1x18x72xf32>
    %53 = vector.shape_cast %52 : vector<1x18x72xf32> to vector<18x72xf32>
    %54 = vector.extract_strided_slice %53 {offsets = [0, 0], sizes = [18, 64], strides = [1, 1]} : vector<18x72xf32> to vector<18x64xf32>
    %55 = vector.extract_strided_slice %53 {offsets = [0, 4], sizes = [18, 64], strides = [1, 1]} : vector<18x72xf32> to vector<18x64xf32>
    %56 = arith.maximumf %54, %55 : vector<18x64xf32>
    %57 = vector.extract_strided_slice %53 {offsets = [0, 8], sizes = [18, 64], strides = [1, 1]} : vector<18x72xf32> to vector<18x64xf32>
    %58 = arith.maximumf %56, %57 : vector<18x64xf32>
    %59 = vector.extract_strided_slice %58 {offsets = [0, 0], sizes = [16, 64], strides = [1, 1]} : vector<18x64xf32> to vector<16x64xf32>
    %60 = vector.extract_strided_slice %58 {offsets = [1, 0], sizes = [16, 64], strides = [1, 1]} : vector<18x64xf32> to vector<16x64xf32>
    %61 = arith.maximumf %59, %60 : vector<16x64xf32>
    %62 = vector.extract_strided_slice %58 {offsets = [2, 0], sizes = [16, 64], strides = [1, 1]} : vector<18x64xf32> to vector<16x64xf32>
    %63 = arith.maximumf %61, %62 : vector<16x64xf32>
    %c0_52 = arith.constant 0 : index
    %c0_53 = arith.constant 0 : index
    %64 = vector.load %arg7[%c0_52, %c0_53] : memref<64x128xf32, #tpu.memory_space<vmem>>, vector<64x128xf32>
    %cst_54 = arith.constant dense<0.000000e+00> : vector<16x128xf32>
    %65 = tpu.matmul %63, %64, %cst_54 {dimension_numbers = #tpu.dot_dimension_numbers<[1], [0], [0], [1], [0, 0, 1, 1], [], []>} : vector<16x64xf32>, vector<64x128xf32>, vector<16x128xf32> -> vector<16x128xf32>
    %c0_55 = arith.constant 0 : index
    %c0_56 = arith.constant 0 : index
    %66 = vector.load %arg8[%c0_55, %c0_56] : memref<1x128xf32, #tpu.memory_space<vmem>>, vector<1x128xf32>
    %67 = vector.broadcast %66 : vector<1x128xf32> to vector<16x128xf32>
    %68 = arith.addf %65, %67 : vector<16x128xf32>
    %cst_57 = arith.constant 0.000000e+00 : f32
    %69 = vector.broadcast %cst_57 : f32 to vector<16x128xf32>
    %70 = arith.maximumf %68, %69 : vector<16x128xf32>
    %c0_58 = arith.constant 0 : index
    %c0_59 = arith.constant 0 : index
    %c0_60 = arith.constant 0 : index
    %71 = vector.load %arg11[%c0_58, %c0_59, %c0_60] : memref<1x16x128xf32, #tpu.memory_space<vmem>>, vector<1x16x128xf32>
    %72 = vector.shape_cast %71 : vector<1x16x128xf32> to vector<16x128xf32>
    %73 = vector.shape_cast %70 : vector<16x128xf32> to vector<1x16x128xf32>
    tpu.vector_store %arg11[%c0_58, %c0_59, %c0_60], %73 {strides = array<i32>} : memref<1x16x128xf32, #tpu.memory_space<vmem>>, vector<1x16x128xf32>,
    return
  }
  func.func @transform_0(%arg0: i32) -> (i32, i32, i32) {
    %c0_i32 = arith.constant 0 : i32
    %c0_i32_0 = arith.constant 0 : i32
    %c0_i32_1 = arith.constant 0 : i32
    return %arg0, %c0_i32, %c0_i32_0 : i32, i32, i32
  }
  func.func @transform_1(%arg0: i32) -> (i32, i32, i32) {
    %c0_i32 = arith.constant 0 : i32
    %c0_i32_0 = arith.constant 0 : i32
    %c0_i32_1 = arith.constant 0 : i32
    return %arg0, %c0_i32, %c0_i32_0 : i32, i32, i32
  }
  func.func @transform_2(%arg0: i32) -> (i32, i32) {
    %c0_i32 = arith.constant 0 : i32
    %c0_i32_0 = arith.constant 0 : i32
    %c0_i32_1 = arith.constant 0 : i32
    return %c0_i32, %c0_i32_0 : i32, i32
  }
  func.func @transform_3(%arg0: i32) -> (i32, i32) {
    %c0_i32 = arith.constant 0 : i32
    %c0_i32_0 = arith.constant 0 : i32
    %c0_i32_1 = arith.constant 0 : i32
    return %c0_i32, %c0_i32_0 : i32, i32
  }
  func.func @transform_4(%arg0: i32) -> (i32, i32, i32) {
    %c0_i32 = arith.constant 0 : i32
    %c0_i32_0 = arith.constant 0 : i32
    %c0_i32_1 = arith.constant 0 : i32
    %c0_i32_2 = arith.constant 0 : i32
    return %c0_i32, %c0_i32_0, %c0_i32_1 : i32, i32, i32
  }
  func.func @transform_5(%arg0: i32) -> (i32, i32) {
    %c0_i32 = arith.constant 0 : i32
    %c0_i32_0 = arith.constant 0 : i32
    %c0_i32_1 = arith.constant 0 : i32
    return %c0_i32, %c0_i32_0 : i32, i32
  }
  func.func @transform_6(%arg0: i32) -> (i32, i32) {
    %c0_i32 = arith.constant 0 : i32
    %c0_i32_0 = arith.constant 0 : i32
    %c0_i32_1 = arith.constant 0 : i32
    return %c0_i32, %c0_i32_0 : i32, i32
  }
  func.func @transform_7(%arg0: i32) -> (i32, i32) {
    %c0_i32 = arith.constant 0 : i32
    %c0_i32_0 = arith.constant 0 : i32
    %c0_i32_1 = arith.constant 0 : i32
    return %c0_i32, %c0_i32_0 : i32, i32
  }
  func.func @transform_8(%arg0: i32) -> (i32, i32, i32) {
    %c0_i32 = arith.constant 0 : i32
    %c0_i32_0 = arith.constant 0 : i32
    %c0_i32_1 = arith.constant 0 : i32
    return %arg0, %c0_i32, %c0_i32_0 : i32, i32, i32
  }
  func.func @transform_9(%arg0: i32) -> (i32, i32, i32) {
    %c0_i32 = arith.constant 0 : i32
    %c0_i32_0 = arith.constant 0 : i32
    %c0_i32_1 = arith.constant 0 : i32
    return %arg0, %c0_i32, %c0_i32_0 : i32, i32, i32
  }
  func.func @transform_10(%arg0: i32) -> (i32, i32, i32) {
    %c0_i32 = arith.constant 0 : i32
    %c0_i32_0 = arith.constant 0 : i32
    %c0_i32_1 = arith.constant 0 : i32
    return %arg0, %c0_i32, %c0_i32_0 : i32, i32, i32
  }
}

</mosaic_0001>

<bundles_post_ra>
// kernel: tile.33
= control target key start
LH: loop header
LB: loop body
LE: loop exit
PB: predicated region body
PF: predicated region fallthrough
CT: control target
= control target key end

     0   :  { %s28_s0 = inlined_call_operand.vmem [shape: f32[8], index: 0, kind: input, shape index: {}]   ;;  %s29_s1 = inlined_call_operand.vmem [shape: f32[16,8], index: 1, kind: output, shape index: {}]  }
   0x1   :  { %v4_v0 = vld [vmem:[%s28_s0] ss:$0 sm:$0xff] }
   0x2   :  { %5 = vst [vmem:[%s29_s1] sm:$0xff] %v4_v0  ;;  %8 = vst [vmem:[%s29_s1 + $0x8] sm:$0xff] %v4_v0 }

// kernel: tile.34
= control target key start
LH: loop header
LB: loop body
LE: loop exit
PB: predicated region body
PF: predicated region fallthrough
CT: control target
= control target key end

     0   :  { %s133_s10 = smov 120   ;;  %s134_s11 = smov 104   ;;  %vm3_vm0 = vcmask 64512   ;;  %vm9_vm1 = vcmask 1048512   ;;  %vm15_vm2 = vcmask 982912   ;;  %vm21_vm3 = vcmask 917312   ;;  %s209_s0 = inlined_call_operand.vmem [shape: f32[16,8], index: 0, kind: input, shape index: {}]   ;;  %s210_s1 = inlined_call_operand.vmem [shape: f32[1,128], index: 1, kind: output, shape index: {}]  }
   0x1   :  { %v103_v0 = vld [vmem:[%s209_s0 + $0xf] sm:$0x1]   ;;  %v105_v1 = vld [vmem:[%s209_s0 + $0xd] sm:$0x1]   ;;  %v104_v2 = vld [vmem:[%s209_s0 + $0xe] sm:$0x1]  }
   0x2   :  { %7 = vrot.lane.b32.xlu0 %v103_v0, %s133_s10  ;;  %19 = vrot.lane.b32.xlu1 %v105_v1, %s134_s11  ;;  %v106_v3 = vld [vmem:[%s209_s0 + $0xc] sm:$0x1]   ;;  %s135_s16 = smov 112   ;;  %s136_s17 = smov 96   ;;  %v107_v4 = vld [vmem:[%s209_s0 + $0xb] sm:$0x1]  }
   0x3   :  { %v108_v5 = vld [vmem:[%s209_s0 + $0xa] sm:$0x1]   ;;  %v2_v6 = vld [vmem:[%s209_s0] sm:$0x1]   ;;  %s137_s24 = smov 88   ;;  %s138_s25 = smov 80  }
   0x4   :  { %4 = vst.msk [vmem:[#allocation0] sm:$0x1] %vm3_vm0, %v2_v6   ;;  %v109_v7 = vld [vmem:[%s209_s0 + $0x9] sm:$0x1]   ;;  %v110_v8 = vld [vmem:[%s209_s0 + $0x8] sm:$0x1]  }
   0x5   :  { %s139_s30 = smov 72   ;;  %s140_s2 = smov 64   ;;  %v111_v9 = vld [vmem:[%s209_s0 + $0x7] sm:$0x1]   ;;  %v112_v10 = vld [vmem:[%s209_s0 + $0x6] sm:$0x1]  }
   0x6   :  { %13 = vrot.lane.b32.xlu0 %v104_v2, %s135_s16  ;;  %25 = vrot.lane.b32.xlu1 %v106_v3, %s136_s17  ;;  %s141_s7 = smov 56   ;;  %s142_s8 = smov 48   ;;  %v113_v11 = vld [vmem:[%s209_s0 + $0x5] sm:$0x1]   ;;  %v114_v12 = vld [vmem:[%s209_s0 + $0x4] sm:$0x1]  }
   0x7   :  { %s143_s13 = smov 40   ;;  %s144_s14 = smov 32   ;;  %v115_v13 = vld [vmem:[%s209_s0 + $0x3] sm:$0x1]   ;;  %v116_v14 = vld [vmem:[%s209_s0 + $0x2] sm:$0x1]  }
   0x8   :  { %s145_s19 = smov 24   ;;  %s146_s20 = smov 16   ;;  %v117_v15 = vld [vmem:[%s209_s0 + $0x1] sm:$0x1]   ;;  %vm27_vm4 = vcmask 851712   ;;  %vm33_vm5 = vcmask 786112  }
   0x9   :  { %s147_s0 = smov 8   ;;  %vm39_vm6 = vcmask 720512   ;;  %vm45_vm7 = vcmask 654912   ;;  %vm51_vm8 = vcmask 589312   ;;  %vm57_vm9 = vcmask 523712  }
   0xa   :  { %31 = vrot.lane.b32.xlu0 %v107_v4, %s137_s24  ;;  %37 = vrot.lane.b32.xlu1 %v108_v5, %s138_s25  ;;  %vm63_vm10 = vcmask 458112   ;;  %vm69_vm11 = vcmask 392512   ;;  %vm75_vm12 = vcmask 326912   ;;  %vm81_vm13 = vcmask 261312  }
   0xb   :  { %vm87_vm14 = vcmask 195712   ;;  %vm93_vm15 = vcmask 130112  }
   0xe   :  { %43 = vrot.lane.b32.xlu0 %v109_v7, %s139_s30  ;;  %49 = vrot.lane.b32.xlu1 %v110_v8, %s140_s2 }
  0x12   :  { %55 = vrot.lane.b32.xlu0 %v111_v9, %s141_s7  ;;  %61 = vrot.lane.b32.xlu1 %v112_v10, %s142_s8 }
  0x16   :  { %67 = vrot.lane.b32.xlu0 %v113_v11, %s143_s13  ;;  %73 = vrot.lane.b32.xlu1 %v114_v12, %s144_s14 }
  0x1a   :  { %79 = vrot.lane.b32.xlu0 %v115_v13, %s145_s19  ;;  %85 = vrot.lane.b32.xlu1 %v116_v14, %s146_s20 }
  0x1e   :  { %91 = vrot.lane.b32.xlu0 %v117_v15, %s147_s0 }
  0x74   :  { %v8_v16 = vpop.permute.xlu0 %7   ;;  %v20_v17 = vpop.permute.xlu1 %19  }
  0x75   :  { %10 = vst.msk [vmem:[#allocation0] sm:$0x1] %vm9_vm1, %v8_v16  }
  0x78   :  { %v14_v18 = vpop.permute.xlu0 %13   ;;  %v26_v19 = vpop.permute.xlu1 %25  }
  0x79   :  { %16 = vst.msk [vmem:[#allocation0] sm:$0x1] %vm15_vm2, %v14_v18  }
  0x7a   :  { %22 = vst.msk [vmem:[#allocation0] sm:$0x1] %vm21_vm3, %v20_v17  }
  0x7b   :  { %28 = vst.msk [vmem:[#allocation0] sm:$0x1] %vm27_vm4, %v26_v19  }
  0x7c   :  { %v32_v20 = vpop.permute.xlu0 %31   ;;  %v38_v21 = vpop.permute.xlu1 %37  }
  0x7d   :  { %34 = vst.msk [vmem:[#allocation0] sm:$0x1] %vm33_vm5, %v32_v20  }
  0x7e   :  { %40 = vst.msk [vmem:[#allocation0] sm:$0x1] %vm39_vm6, %v38_v21  }
  0x80   :  { %v44_v22 = vpop.permute.xlu0 %43   ;;  %v50_v23 = vpop.permute.xlu1 %49  }
  0x81   :  { %46 = vst.msk [vmem:[#allocation0] sm:$0x1] %vm45_vm7, %v44_v22  }
  0x82   :  { %52 = vst.msk [vmem:[#allocation0] sm:$0x1] %vm51_vm8, %v50_v23  }
  0x84   :  { %v56_v24 = vpop.permute.xlu0 %55   ;;  %v62_v25 = vpop.permute.xlu1 %61  }
  0x85   :  { %58 = vst.msk [vmem:[#allocation0] sm:$0x1] %vm57_vm9, %v56_v24  }
  0x86   :  { %64 = vst.msk [vmem:[#allocation0] sm:$0x1] %vm63_vm10, %v62_v25  }
  0x88   :  { %v68_v26 = vpop.permute.xlu0 %67   ;;  %v74_v27 = vpop.permute.xlu1 %73  }
  0x89   :  { %70 = vst.msk [vmem:[#allocation0] sm:$0x1] %vm69_vm11, %v68_v26  }
  0x8a   :  { %76 = vst.msk [vmem:[#allocation0] sm:$0x1] %vm75_vm12, %v74_v27  }
  0x8c   :  { %v80_v28 = vpop.permute.xlu0 %79   ;;  %v86_v29 = vpop.permute.xlu1 %85  }
  0x8d   :  { %82 = vst.msk [vmem:[#allocation0] sm:$0x1] %vm81_vm13, %v80_v28  }
  0x8e   :  { %88 = vst.msk [vmem:[#allocation0] sm:$0x1] %vm87_vm14, %v86_v29  }
  0x90   :  { %v92_v30 = vpop.permute.xlu0 %91  }
  0x91   :  { %94 = vst.msk [vmem:[#allocation0] sm:$0x1] %vm93_vm15, %v92_v30  }
  0x98   :  { %v99_v31 = vld [vmem:[#allocation0] sm:$0x1] }
  0x99   :  { %102 = vst [vmem:[%s210_s1] sm:$0x1] %v99_v31 }

// kernel: tile.38
= control target key start
LH: loop header
LB: loop body
LE: loop exit
PB: predicated region body
PF: predicated region fallthrough
CT: control target
= control target key end

     0   :  { %s28_s0 = inlined_call_operand.vmem [shape: f32[4], index: 0, kind: input, shape index: {}]   ;;  %s29_s1 = inlined_call_operand.vmem [shape: f32[16,4], index: 1, kind: output, shape index: {}]  }
   0x1   :  { %v4_v0 = vld [vmem:[%s28_s0] ss:$0 sm:$0xff] }
   0x2   :  { %5 = vst [vmem:[%s29_s1] sm:$0xff] %v4_v0  ;;  %8 = vst [vmem:[%s29_s1 + $0x8] sm:$0xff] %v4_v0 }

// kernel: tile.39
= control target key start
LH: loop header
LB: loop body
LE: loop exit
PB: predicated region body
PF: predicated region fallthrough
CT: control target
= control target key end

     0   :  { %s133_s10 = smov 60   ;;  %s134_s11 = smov 52   ;;  %vm3_vm0 = vcmask 31744   ;;  %vm9_vm1 = vcmask 523744   ;;  %vm15_vm2 = vcmask 490944   ;;  %vm21_vm3 = vcmask 458144   ;;  %s209_s0 = inlined_call_operand.vmem [shape: f32[16,4], index: 0, kind: input, shape index: {}]   ;;  %s210_s1 = inlined_call_operand.vmem [shape: f32[1,64], index: 1, kind: output, shape index: {}]  }
   0x1   :  { %v103_v0 = vld [vmem:[%s209_s0 + $0xf] sm:$0x1]   ;;  %v105_v1 = vld [vmem:[%s209_s0 + $0xd] sm:$0x1]   ;;  %v104_v2 = vld [vmem:[%s209_s0 + $0xe] sm:$0x1]  }
   0x2   :  { %7 = vrot.lane.b32.xlu0 %v103_v0, %s133_s10  ;;  %19 = vrot.lane.b32.xlu1 %v105_v1, %s134_s11  ;;  %v106_v3 = vld [vmem:[%s209_s0 + $0xc] sm:$0x1]   ;;  %s135_s16 = smov 56   ;;  %s136_s17 = smov 48   ;;  %v107_v4 = vld [vmem:[%s209_s0 + $0xb] sm:$0x1]  }
   0x3   :  { %v108_v5 = vld [vmem:[%s209_s0 + $0xa] sm:$0x1]   ;;  %v2_v6 = vld [vmem:[%s209_s0] sm:$0x1]   ;;  %s137_s24 = smov 44   ;;  %s138_s25 = smov 40  }
   0x4   :  { %4 = vst.msk [vmem:[#allocation0] sm:$0x1] %vm3_vm0, %v2_v6   ;;  %v109_v7 = vld [vmem:[%s209_s0 + $0x9] sm:$0x1]   ;;  %v110_v8 = vld [vmem:[%s209_s0 + $0x8] sm:$0x1]  }
   0x5   :  { %s139_s30 = smov 36   ;;  %s140_s2 = smov 32   ;;  %v111_v9 = vld [vmem:[%s209_s0 + $0x7] sm:$0x1]   ;;  %v112_v10 = vld [vmem:[%s209_s0 + $0x6] sm:$0x1]  }
   0x6   :  { %13 = vrot.lane.b32.xlu0 %v104_v2, %s135_s16  ;;  %25 = vrot.lane.b32.xlu1 %v106_v3, %s136_s17  ;;  %s141_s7 = smov 28   ;;  %s142_s8 = smov 24   ;;  %v113_v11 = vld [vmem:[%s209_s0 + $0x5] sm:$0x1]   ;;  %v114_v12 = vld [vmem:[%s209_s0 + $0x4] sm:$0x1]  }
   0x7   :  { %s143_s13 = smov 20   ;;  %s144_s14 = smov 16   ;;  %v115_v13 = vld [vmem:[%s209_s0 + $0x3] sm:$0x1]   ;;  %v116_v14 = vld [vmem:[%s209_s0 + $0x2] sm:$0x1]  }
   0x8   :  { %s145_s19 = smov 12   ;;  %s146_s20 = smov 8   ;;  %v117_v15 = vld [vmem:[%s209_s0 + $0x1] sm:$0x1]   ;;  %vm27_vm4 = vcmask 425344   ;;  %vm33_vm5 = vcmask 392544  }
   0x9   :  { %s147_s0 = smov 4   ;;  %vm39_vm6 = vcmask 359744   ;;  %vm45_vm7 = vcmask 326944   ;;  %vm51_vm8 = vcmask 294144   ;;  %vm57_vm9 = vcmask 261344  }
   0xa   :  { %31 = vrot.lane.b32.xlu0 %v107_v4, %s137_s24  ;;  %37 = vrot.lane.b32.xlu1 %v108_v5, %s138_s25  ;;  %vm63_vm10 = vcmask 228544   ;;  %vm69_vm11 = vcmask 195744   ;;  %vm75_vm12 = vcmask 162944   ;;  %vm81_vm13 = vcmask 130144  }
   0xb   :  { %vm87_vm14 = vcmask 97344   ;;  %vm93_vm15 = vcmask 64544  }
   0xe   :  { %43 = vrot.lane.b32.xlu0 %v109_v7, %s139_s30  ;;  %49 = vrot.lane.b32.xlu1 %v110_v8, %s140_s2 }
  0x12   :  { %55 = vrot.lane.b32.xlu0 %v111_v9, %s141_s7  ;;  %61 = vrot.lane.b32.xlu1 %v112_v10, %s142_s8 }
  0x16   :  { %67 = vrot.lane.b32.xlu0 %v113_v11, %s143_s13  ;;  %73 = vrot.lane.b32.xlu1 %v114_v12, %s144_s14 }
  0x1a   :  { %79 = vrot.lane.b32.xlu0 %v115_v13, %s145_s19  ;;  %85 = vrot.lane.b32.xlu1 %v116_v14, %s146_s20 }
  0x1e   :  { %91 = vrot.lane.b32.xlu0 %v117_v15, %s147_s0 }
  0x74   :  { %v8_v16 = vpop.permute.xlu0 %7   ;;  %v20_v17 = vpop.permute.xlu1 %19  }
  0x75   :  { %10 = vst.msk [vmem:[#allocation0] sm:$0x1] %vm9_vm1, %v8_v16  }
  0x78   :  { %v14_v18 = vpop.permute.xlu0 %13   ;;  %v26_v19 = vpop.permute.xlu1 %25  }
  0x79   :  { %16 = vst.msk [vmem:[#allocation0] sm:$0x1] %vm15_vm2, %v14_v18  }
  0x7a   :  { %22 = vst.msk [vmem:[#allocation0] sm:$0x1] %vm21_vm3, %v20_v17  }
  0x7b   :  { %28 = vst.msk [vmem:[#allocation0] sm:$0x1] %vm27_vm4, %v26_v19  }
  0x7c   :  { %v32_v20 = vpop.permute.xlu0 %31   ;;  %v38_v21 = vpop.permute.xlu1 %37  }
  0x7d   :  { %34 = vst.msk [vmem:[#allocation0] sm:$0x1] %vm33_vm5, %v32_v20  }
  0x7e   :  { %40 = vst.msk [vmem:[#allocation0] sm:$0x1] %vm39_vm6, %v38_v21  }
  0x80   :  { %v44_v22 = vpop.permute.xlu0 %43   ;;  %v50_v23 = vpop.permute.xlu1 %49  }
  0x81   :  { %46 = vst.msk [vmem:[#allocation0] sm:$0x1] %vm45_vm7, %v44_v22  }
  0x82   :  { %52 = vst.msk [vmem:[#allocation0] sm:$0x1] %vm51_vm8, %v50_v23  }
  0x84   :  { %v56_v24 = vpop.permute.xlu0 %55   ;;  %v62_v25 = vpop.permute.xlu1 %61  }
  0x85   :  { %58 = vst.msk [vmem:[#allocation0] sm:$0x1] %vm57_vm9, %v56_v24  }
  0x86   :  { %64 = vst.msk [vmem:[#allocation0] sm:$0x1] %vm63_vm10, %v62_v25  }
  0x88   :  { %v68_v26 = vpop.permute.xlu0 %67   ;;  %v74_v27 = vpop.permute.xlu1 %73  }
  0x89   :  { %70 = vst.msk [vmem:[#allocation0] sm:$0x1] %vm69_vm11, %v68_v26  }
  0x8a   :  { %76 = vst.msk [vmem:[#allocation0] sm:$0x1] %vm75_vm12, %v74_v27  }
  0x8c   :  { %v80_v28 = vpop.permute.xlu0 %79   ;;  %v86_v29 = vpop.permute.xlu1 %85  }
  0x8d   :  { %82 = vst.msk [vmem:[#allocation0] sm:$0x1] %vm81_vm13, %v80_v28  }
  0x8e   :  { %88 = vst.msk [vmem:[#allocation0] sm:$0x1] %vm87_vm14, %v86_v29  }
  0x90   :  { %v92_v30 = vpop.permute.xlu0 %91  }
  0x91   :  { %94 = vst.msk [vmem:[#allocation0] sm:$0x1] %vm93_vm15, %v92_v30  }
  0x98   :  { %v99_v31 = vld [vmem:[#allocation0] sm:$0x1] }
  0x99   :  { %102 = vst [vmem:[%s210_s1] sm:$0x1] %v99_v31 }

// kernel: inception_forward.1
= control target key start
LH: loop header
LB: loop body
LE: loop exit
PB: predicated region body
PF: predicated region fallthrough
CT: control target
= control target key end

     0   :  { %s1670_s13 = smov 0   ;;  %s2346_s0 = inlined_call_operand.vmem [shape: f32[2,16,64], index: 0, kind: input, shape index: {}]   ;;  %s2347_s1 = inlined_call_operand.vmem [shape: f32[2,18,72], index: 1, kind: input, shape index: {}]   ;;  %s2348_s2 = inlined_call_operand.vmem [shape: f32[64,256], index: 2, kind: input, shape index: {}]   ;;  %s2349_s3 = inlined_call_operand.vmem [shape: f32[1,256], index: 3, kind: input, shape index: {}]   ;;  %s2350_s4 = inlined_call_operand.vmem [shape: f32[5,128,256], index: 4, kind: input, shape index: {}]   ;;  %s2351_s5 = inlined_call_operand.vmem [shape: f32[1,256], index: 5, kind: input, shape index: {}]   ;;  %s2352_s6 = inlined_call_operand.vmem [shape: f32[64,128], index: 6, kind: input, shape index: {}]   ;;  %s2353_s7 = inlined_call_operand.vmem [shape: f32[1,128], index: 7, kind: input, shape index: {}]   ;;  %s2354_s8 = inlined_call_operand.vmem [shape: f32[2,16,128], index: 8, kind: output, shape index: {0}]   ;;  %s2355_s9 = inlined_call_operand.vmem [shape: f32[2,16,256], index: 9, kind: output, shape index: {1}]   ;;  %s2356_s10 = inlined_call_operand.vmem [shape: f32[2,16,128], index: 10, kind: output, shape index: {2}]  }
   0x1 LB: > { %s1410_s14 = sadd.s32 4294967295, %s1610_s13   ;;  %p1414_p0 = scmp.ge.s32.totalorder %s1610_s13, 1  ;;  %s1610_s13 = sphi %s1670_s13, %s21_s13  }
   0x2   : > { %p327_p1 = scmp.lt.s32.totalorder %s1610_s13, 3 }
   0x4   : > { %p328_p2 = pnand %p1414_p0, %p327_p1 }
   0x5   : > { %p380_p3 = scmp.lt.s32.totalorder (!%p328_p2), %s1410_s14, 1  ;;  %s1613_s28 = smov (!%p328_p2), 124  }
   0x6   : > { %331 = sbr.rel (%p328_p2) target bundleno = 510 (0x1fe), region = 52  ;;  %s1614_s16 = smov (!%p328_p2), 120  }
   0xb   : > { %v422_v0 = vld [vmem:[%s2348_s2 + $0x78] sm:$0xff]  ;;  %v421_v1 = vld [vmem:[%s2348_s2 + $0x70] sm:$0xff]  ;;  %v420_v2 = vld [vmem:[%s2348_s2 + $0x68] sm:$0xff]  ;;  %v1612_v4 = vmov 0.0   ;;  %s2358_s14 = smov (!%p380_p3, %s1410_s14), 1  ;;  %vm435_vm0 = vcmask 523264  }
   0xc   : > { %458 = vmatprep.subr.mxu0 %v422_v0  ;;  %v419_v3 = vld [vmem:[%s2348_s2 + $0x60] sm:$0xff]  ;;  %506 = vmatprep.mubr.f32.mxu0 %v1612_v4  ;;  %525 = vst [vmem:[#allocation2] sm:$0x3] %v1612_v4  ;;  %526 = vst [vmem:[#allocation2 + $0x12] sm:$0x3] %v1612_v4  ;;  %v418_v5 = vld [vmem:[%s2348_s2 + $0x58] sm:$0xff] }
   0xd   : > { %459 = vmatpush1.msra.mxu0 %v421_v1  ;;  %662 = vmatprep.mubr.f32.mxu1 %v1612_v4  ;;  %v417_v6 = vld [vmem:[%s2348_s2 + $0x50] sm:$0xff]  ;;  %v416_v7 = vld [vmem:[%s2348_s2 + $0x48] sm:$0xff]  ;;  %s1592_s29 = smul.u32 24, %s2358_s14  ;;  %v415_v8 = vld [vmem:[%s2348_s2 + $0x40] sm:$0xff]  ;;  %s1732_s27 = sshll.u32 %s2358_s14, 4  ;;  %vm1157_vm1 = vcmask 1046528  }
   0xe   : > { %460 = vmatprep.subr.mxu0 %v420_v2  ;;  %v1457_v9 = vld [vmem:[%s2350_s4 + $0x1f8] sm:$0xff]  ;;  %v1456_v11 = vld [vmem:[%s2350_s4 + $0x1f0] sm:$0xff]  ;;  %v412_v15 = vld [vmem:[%s2348_s2 + $0x28] sm:$0xff]  ;;  %s394_s22 = scalar_lea.vmem %s2354_s8, %s1732_s27  ;;  %vm1167_vm2 = vcmask 1045504  }
   0xf   : > { %461 = vmatpush1.msra.mxu0 %v419_v3  ;;  %v414_v10 = vld [vmem:[%s2348_s2 + $0x38] sm:$0xff]  ;;  %s389_s20 = scalar_lea.vmem %s2347_s1, %s1592_s29  ;;  %598 = vmatprep.subr.mxu1 %v1457_v9  ;;  %v413_v12 = vld [vmem:[%s2348_s2 + $0x30] sm:$0xff]  ;;  %v1455_v16 = vld [vmem:[%s2350_s4 + $0x1e8] sm:$0xff]  ;;  %s404_s29 = scalar_lea.vmem %s2356_s10, %s1732_s27 }
  0x10   : > { %462 = vmatprep.subr.mxu0 %v418_v5  ;;  %v1724_v13 = vld [vmem:[%s389_s20] sm:$0xff]  ;;  %v1726_v14 = vld [vmem:[%s389_s20 + $0x10] sm:$0x3]  ;;  %599 = vmatpush1.msra.mxu1 %v1456_v11  ;;  %v1742_v18 = vld [vmem:[%s389_s20 + $0x8] sm:$0xff]  ;;  %s384_s20 = scalar_lea.vmem %s2346_s0, %s1732_s27  ;;  %s1561_s27 = sshll.u32 %s2358_s14, 5 }
  0x11   : > { %463 = vmatpush1.msra.mxu0 %v417_v6  ;;  %1130 = vrot.lane.b32.xlu0 %v1724_v13, %s1613_s28  ;;  %v411_v17 = vld [vmem:[%s2348_s2 + $0x20] sm:$0xff]  ;;  %v410_v20 = vld [vmem:[%s2348_s2 + $0x18] sm:$0xff]  ;;  %v409_v21 = vld [vmem:[%s2348_s2 + $0x10] sm:$0xff] }
  0x12   : > { %464 = vmatprep.subr.mxu0 %v416_v7  ;;  %1134 = vrot.lane.b32.xlu1 %v1726_v14, %s1613_s28  ;;  %v1454_v19 = vld [vmem:[%s2350_s4 + $0x1e0] sm:$0xff]  ;;  %v1453_v22 = vld [vmem:[%s2350_s4 + $0x1d8] sm:$0xff]  ;;  %v408_v23 = vld [vmem:[%s2348_s2 + $0x8] sm:$0xff] }
  0x13   : > { %465 = vmatpush1.msra.mxu0 %v415_v8  ;;  %600 = vmatprep.subr.mxu1 %v1455_v16  ;;  %v1452_v24 = vld [vmem:[%s2350_s4 + $0x1d0] sm:$0xff]  ;;  %v407_v25 = vld [vmem:[%s2348_s2] sm:$0xff]  ;;  %v562_v27 = vld [vmem:[%s2350_s4 + $0xf8] sm:$0xff] }
  0x14   : > { %466 = vmatprep.subr.mxu0 %v414_v10  ;;  %601 = vmatpush1.msra.mxu1 %v1454_v19  ;;  %v405_v26 = vld [vmem:[%s384_s20] sm:$0xff]  ;;  %v561_v28 = vld [vmem:[%s2350_s4 + $0xf0] sm:$0xff]  ;;  %v1451_v29 = vld [vmem:[%s2350_s4 + $0x1c8] sm:$0xff] }
  0x15   : > { %467 = vmatpush1.msra.mxu0 %v413_v12  ;;  %1132 = vrot.lane.b32.xlu0 %v1742_v18, %s1613_s28  ;;  %v560_v30 = vld [vmem:[%s2350_s4 + $0xe8] sm:$0xff]  ;;  %v1450_v31 = vld [vmem:[%s2350_s4 + $0x1c0] sm:$0xff]  ;;  %v1449_v33 = vld [vmem:[%s2350_s4 + $0x1b8] sm:$0xff] }
  0x16   : > { %468 = vmatprep.subr.mxu0 %v412_v15  ;;  %1142 = vrot.lane.b32.xlu1 %v1724_v13, %s1614_s16  ;;  %v406_v32 = vld [vmem:[%s384_s20 + $0x8] sm:$0xff]  ;;  %v559_v34 = vld [vmem:[%s2350_s4 + $0xe0] sm:$0xff]  ;;  %v1448_v35 = vld [vmem:[%s2350_s4 + $0x1b0] sm:$0xff] }
  0x17   : > { %469 = vmatpush1.msra.mxu0 %v411_v17  ;;  %602 = vmatprep.subr.mxu1 %v1453_v22  ;;  %v558_v36 = vld [vmem:[%s2350_s4 + $0xd8] sm:$0xff]  ;;  %v1447_v37 = vld [vmem:[%s2350_s4 + $0x1a8] sm:$0xff]  ;;  %v557_v38 = vld [vmem:[%s2350_s4 + $0xd0] sm:$0xff] }
  0x18   : > { %470 = vmatprep.subr.mxu0 %v410_v20  ;;  %603 = vmatpush1.msra.mxu1 %v1452_v24  ;;  %v1446_v39 = vld [vmem:[%s2350_s4 + $0x1a0] sm:$0xff]  ;;  %v556_v40 = vld [vmem:[%s2350_s4 + $0xc8] sm:$0xff]  ;;  %v1445_v41 = vld [vmem:[%s2350_s4 + $0x198] sm:$0xff] }
  0x19   : > { %471 = vmatpush1.msra.mxu0 %v409_v21  ;;  %1144 = vrot.lane.b32.xlu0 %v1742_v18, %s1614_s16  ;;  %v555_v42 = vld [vmem:[%s2350_s4 + $0xc0] sm:$0xff]  ;;  %v1444_v43 = vld [vmem:[%s2350_s4 + $0x190] sm:$0xff]  ;;  %v554_v44 = vld [vmem:[%s2350_s4 + $0xb8] sm:$0xff] }
  0x1a   : > { %472 = vmatprep.subr.mxu0 %v408_v23  ;;  %1146 = vrot.lane.b32.xlu1 %v1726_v14, %s1614_s16  ;;  %v1443_v45 = vld [vmem:[%s2350_s4 + $0x188] sm:$0xff]  ;;  %v553_v46 = vld [vmem:[%s2350_s4 + $0xb0] sm:$0xff]  ;;  %v1442_v47 = vld [vmem:[%s2350_s4 + $0x180] sm:$0xff]  ;;  %s399_s16 = scalar_lea.vmem %s2355_s9, %s1561_s27 }
  0x1b   : > { %473 = vmatpush1.msra.mxu0 %v407_v25  ;;  %604 = vmatprep.subr.mxu1 %v1451_v29  ;;  %v552_v48 = vld [vmem:[%s2350_s4 + $0xa8] sm:$0xff]  ;;  %v1441_v49 = vld [vmem:[%s2350_s4 + $0x178] sm:$0xff]  ;;  %v551_v50 = vld [vmem:[%s2350_s4 + $0xa0] sm:$0xff] }
  0x1c   : > { %1424 = vmatmul.mubr.msk.f32.vlgmr.msra.gmra.mxu0 %vm435_vm0, %v405_v26  ;;  %675 = vmatprep.subr.mxu0 %v562_v27  ;;  %v1440_v51 = vld [vmem:[%s2350_s4 + $0x170] sm:$0xff]  ;;  %v550_v52 = vld [vmem:[%s2350_s4 + $0x98] sm:$0xff]  ;;  %v548_v54 = vld [vmem:[%s2350_s4 + $0x88] sm:$0xff] }
  0x1d   : > { %512 = vmatprep.mubr.f32.mxu0 %v1612_v4  ;;  %676 = vmatpush1.msra.mxu0 %v561_v28  ;;  %v549_v53 = vld [vmem:[%s2350_s4 + $0x90] sm:$0xff]  ;;  %v547_v55 = vld [vmem:[%s2350_s4 + $0x80] sm:$0xff]  ;;  %v546_v56 = vld [vmem:[%s2350_s4 + $0x78] sm:$0xff]  ;;  %v425_v28 = vlaneseq }
  0x1e   : > { %677 = vmatprep.subr.mxu0 %v560_v30  ;;  %605 = vmatpush1.msra.mxu1 %v1450_v31  ;;  %v545_v57 = vld [vmem:[%s2350_s4 + $0x70] sm:$0xff]  ;;  %v1439_v58 = vld [vmem:[%s2350_s4 + $0x168] sm:$0xff]  ;;  %v1438_v60 = vld [vmem:[%s2350_s4 + $0x160] sm:$0xff] }
  0x1f   : > { %606 = vmatprep.subr.mxu1 %v1449_v33  ;;  %678 = vmatpush1.msra.mxu0 %v559_v34  ;;  %v544_v59 = vld [vmem:[%s2350_s4 + $0x68] sm:$0xff]  ;;  %v543_v61 = vld [vmem:[%s2350_s4 + $0x60] sm:$0xff]  ;;  %v1437_v62 = vld [vmem:[%s2350_s4 + $0x158] sm:$0xff]  ;;  %v1957_v29 = vshrl.u32 %v425_v28, 7 }
  0x20   : > { %1425 = vmatmul.mubr.msk.f32.gmra.mxu0 %vm435_vm0, %v406_v32  ;;  %607 = vmatpush1.msra.mxu1 %v1448_v35  ;;  %v542_v63 = vld [vmem:[%s2350_s4 + $0x58] sm:$0xff]  ;;  %v1436_v0 = vld [vmem:[%s2350_s4 + $0x150] sm:$0xff]  ;;  %v1435_v2 = vld [vmem:[%s2350_s4 + $0x148] sm:$0xff] }
  0x21   : > { %679 = vmatprep.subr.mxu0 %v558_v36  ;;  %608 = vmatprep.subr.mxu1 %v1447_v37  ;;  %v541_v1 = vld [vmem:[%s2350_s4 + $0x50] sm:$0xff]  ;;  %v540_v3 = vld [vmem:[%s2350_s4 + $0x48] sm:$0xff]  ;;  %v1434_v5 = vld [vmem:[%s2350_s4 + $0x140] sm:$0xff]  ;;  %v427_v30 = vsub.s32 0, %v1957_v29  ;;  %v431_v32 = vsub.s32 1, %v1957_v29 }
  0x22   : > { %680 = vmatpush1.msra.mxu0 %v557_v38  ;;  %609 = vmatpush1.msra.mxu1 %v1446_v39  ;;  %v539_v6 = vld [vmem:[%s2350_s4 + $0x40] sm:$0xff]  ;;  %v1433_v7 = vld [vmem:[%s2350_s4 + $0x138] sm:$0xff]  ;;  %v1432_v9 = vld [vmem:[%s2350_s4 + $0x130] sm:$0xff] }
  0x23   : > { %681 = vmatprep.subr.mxu0 %v556_v40  ;;  %610 = vmatprep.subr.mxu1 %v1445_v41  ;;  %v538_v8 = vld [vmem:[%s2350_s4 + $0x38] sm:$0xff]  ;;  %v537_v10 = vld [vmem:[%s2350_s4 + $0x30] sm:$0xff]  ;;  %v1431_v11 = vld [vmem:[%s2350_s4 + $0x128] sm:$0xff] }
  0x24   : > { %682 = vmatpush1.msra.mxu0 %v555_v42  ;;  %611 = vmatpush1.msra.mxu1 %v1444_v43  ;;  %v536_v12 = vld [vmem:[%s2350_s4 + $0x28] sm:$0xff]  ;;  %v1430_v15 = vld [vmem:[%s2350_s4 + $0x120] sm:$0xff]  ;;  %v1429_v17 = vld [vmem:[%s2350_s4 + $0x118] sm:$0xff] }
  0x25   : > { %683 = vmatprep.subr.mxu0 %v554_v44  ;;  %612 = vmatprep.subr.mxu1 %v1443_v45  ;;  %v535_v16 = vld [vmem:[%s2350_s4 + $0x20] sm:$0xff]  ;;  %v534_v19 = vld [vmem:[%s2350_s4 + $0x18] sm:$0xff]  ;;  %v1428_v20 = vld [vmem:[%s2350_s4 + $0x110] sm:$0xff] }
  0x26   : > { %684 = vmatpush1.msra.mxu0 %v553_v46  ;;  %613 = vmatpush1.msra.mxu1 %v1442_v47  ;;  %v533_v21 = vld [vmem:[%s2350_s4 + $0x10] sm:$0xff]  ;;  %v1427_v22 = vld [vmem:[%s2350_s4 + $0x108] sm:$0xff]  ;;  %v1426_v24 = vld [vmem:[%s2350_s4 + $0x100] sm:$0xff] }
  0x27   : > { %685 = vmatprep.subr.mxu0 %v552_v48  ;;  %614 = vmatprep.subr.mxu1 %v1441_v49  ;;  %v532_v23 = vld [vmem:[%s2350_s4 + $0x8] sm:$0xff]  ;;  %v531_v25 = vld [vmem:[%s2350_s4] sm:$0xff]  ;;  %v1489_v26 = vld [vmem:[%s2350_s4 + $0x2f8] sm:$0xff] }
  0x28   : > { %686 = vmatpush1.msra.mxu0 %v551_v50  ;;  %615 = vmatpush1.msra.mxu1 %v1440_v51  ;;  %v1521_v27 = vld [vmem:[%s2350_s4 + $0x3f8] sm:$0xff]  ;;  %v423_v31 = vld [vmem:[%s2349_s3] sm:$0x3]  ;;  %v1488_v47 = vld [vmem:[%s2350_s4 + $0x2f0] sm:$0xff] }
  0x29   : > { %687 = vmatprep.subr.mxu0 %v550_v52  ;;  %739 = vmatprep.mubr.f32.mxu0 %v1612_v4  ;;  %v428_v33 = vrot.slane %v423_v31, %v427_v30  ;;  %v432_v34 = vrot.slane %v423_v31, %v431_v32  ;;  %v1520_v48 = vld [vmem:[%s2350_s4 + $0x3f0] sm:$0xff]  ;;  %v1487_v49 = vld [vmem:[%s2350_s4 + $0x2e8] sm:$0xff]  ;;  %v1502_v28 = vld [vmem:[%s2350_s4 + $0x360] sm:$0xff] }
  0x2a   : > { %688 = vmatpush1.msra.mxu0 %v549_v53  ;;  %616 = vmatprep.subr.mxu1 %v1439_v58  ;;  %v1519_v52 = vld [vmem:[%s2350_s4 + $0x3e8] sm:$0xff]  ;;  %v1486_v53 = vld [vmem:[%s2350_s4 + $0x2e0] sm:$0xff]  ;;  %v1469_v31 = vld [vmem:[%s2350_s4 + $0x258] sm:$0xff] }
  0x2b   : > { %689 = vmatprep.subr.mxu0 %v548_v54  ;;  %617 = vmatpush1.msra.mxu1 %v1438_v60  ;;  %v1518_v54 = vld [vmem:[%s2350_s4 + $0x3e0] sm:$0xff]  ;;  %v1516_v60 = vld [vmem:[%s2350_s4 + $0x3d0] sm:$0xff] }
  0x2c   : > { %690 = vmatpush1.msra.mxu0 %v547_v55  ;;  %618 = vmatprep.subr.mxu1 %v1437_v62  ;;  %v1485_v55 = vld [vmem:[%s2350_s4 + $0x2d8] sm:$0xff]  ;;  %v1515_v62 = vld [vmem:[%s2350_s4 + $0x3c8] sm:$0xff] }
  0x2d   : > { %691 = vmatprep.subr.mxu0 %v546_v56  ;;  %619 = vmatpush1.msra.mxu1 %v1436_v0  ;;  %v1517_v56 = vld [vmem:[%s2350_s4 + $0x3d8] sm:$0xff]  ;;  %v1514_v0 = vld [vmem:[%s2350_s4 + $0x3c0] sm:$0xff] }
  0x2e   : > { %692 = vmatpush1.msra.mxu0 %v545_v57  ;;  %620 = vmatprep.subr.mxu1 %v1435_v2  ;;  %v1513_v2 = vld [vmem:[%s2350_s4 + $0x3b8] sm:$0xff] }
  0x2f   : > { %693 = vmatprep.subr.mxu0 %v544_v59  ;;  %621 = vmatpush1.msra.mxu1 %v1434_v5  ;;  %v1484_v59 = vld [vmem:[%s2350_s4 + $0x2d0] sm:$0xff] }
  0x30   : > { %694 = vmatpush1.msra.mxu0 %v543_v61  ;;  %622 = vmatprep.subr.mxu1 %v1433_v7  ;;  %v1483_v61 = vld [vmem:[%s2350_s4 + $0x2c8] sm:$0xff]  ;;  %v1512_v5 = vld [vmem:[%s2350_s4 + $0x3b0] sm:$0xff] }
  0x31   : > { %695 = vmatprep.subr.mxu0 %v542_v63  ;;  %623 = vmatpush1.msra.mxu1 %v1432_v9  ;;  %v1482_v63 = vld [vmem:[%s2350_s4 + $0x2c0] sm:$0xff]  ;;  %v1511_v7 = vld [vmem:[%s2350_s4 + $0x3a8] sm:$0xff] }
  0x32   : > { %696 = vmatpush1.msra.mxu0 %v541_v1  ;;  %624 = vmatprep.subr.mxu1 %v1431_v11  ;;  %v1481_v1 = vld [vmem:[%s2350_s4 + $0x2b8] sm:$0xff]  ;;  %v1510_v9 = vld [vmem:[%s2350_s4 + $0x3a0] sm:$0xff] }
  0x33   : > { %697 = vmatprep.subr.mxu0 %v540_v3  ;;  %625 = vmatpush1.msra.mxu1 %v1430_v15  ;;  %v1480_v3 = vld [vmem:[%s2350_s4 + $0x2b0] sm:$0xff]  ;;  %v1509_v11 = vld [vmem:[%s2350_s4 + $0x398] sm:$0xff] }
  0x34   : > { %698 = vmatpush1.msra.mxu0 %v539_v6  ;;  %626 = vmatprep.subr.mxu1 %v1429_v17  ;;  %v1479_v6 = vld [vmem:[%s2350_s4 + $0x2a8] sm:$0xff]  ;;  %v1508_v15 = vld [vmem:[%s2350_s4 + $0x390] sm:$0xff] }
  0x35   : > { %699 = vmatprep.subr.mxu0 %v538_v8  ;;  %627 = vmatpush1.msra.mxu1 %v1428_v20  ;;  %v1478_v8 = vld [vmem:[%s2350_s4 + $0x2a0] sm:$0xff]  ;;  %v1507_v17 = vld [vmem:[%s2350_s4 + $0x388] sm:$0xff] }
  0x36   : > { %700 = vmatpush1.msra.mxu0 %v537_v10  ;;  %628 = vmatprep.subr.mxu1 %v1427_v22  ;;  %v1477_v10 = vld [vmem:[%s2350_s4 + $0x298] sm:$0xff]  ;;  %v1506_v20 = vld [vmem:[%s2350_s4 + $0x380] sm:$0xff] }
  0x37   : > { %701 = vmatprep.subr.mxu0 %v536_v12  ;;  %629 = vmatpush1.msra.mxu1 %v1426_v24  ;;  %v1476_v12 = vld [vmem:[%s2350_s4 + $0x290] sm:$0xff]  ;;  %v1505_v22 = vld [vmem:[%s2350_s4 + $0x378] sm:$0xff] }
  0x38   : > { %702 = vmatpush1.msra.mxu0 %v535_v16  ;;  %787 = vmatprep.subr.mxu1 %v1489_v26  ;;  %v1475_v16 = vld [vmem:[%s2350_s4 + $0x288] sm:$0xff]  ;;  %v1504_v24 = vld [vmem:[%s2350_s4 + $0x370] sm:$0xff] }
  0x39   : > { %703 = vmatprep.subr.mxu0 %v534_v19  ;;  %v1474_v19 = vld [vmem:[%s2350_s4 + $0x280] sm:$0xff]  ;;  %v1503_v26 = vld [vmem:[%s2350_s4 + $0x368] sm:$0xff] }
  0x3a   : > { %704 = vmatpush1.msra.mxu0 %v533_v21  ;;  %v1473_v21 = vld [vmem:[%s2350_s4 + $0x278] sm:$0xff] }
  0x3b   : > { %705 = vmatprep.subr.mxu0 %v532_v23  ;;  %v1472_v23 = vld [vmem:[%s2350_s4 + $0x270] sm:$0xff] }
  0x3c   : > { %706 = vmatpush1.msra.mxu0 %v531_v25  ;;  %v1471_v25 = vld [vmem:[%s2350_s4 + $0x268] sm:$0xff] }
  0x3d   : > { %903 = vmatprep.subr.mxu0 %v1521_v27  ;;  %v1470_v27 = vld [vmem:[%s2350_s4 + $0x260] sm:$0xff] }
  0xdc   : > { %v508_v35 = vpop.f32.mrf.mxu0 }
  0xdd   : > { %v509_v36 = vadd.f32 %v508_v35, %v428_v33  ;;  %v1500_v35 = vld [vmem:[%s2350_s4 + $0x350] sm:$0xff] }
  0xde   : > { %v510_v37 = vpop.f32.mrf.mxu0 }
  0xdf   : > { %v519_v38 = vmax.f32 %v509_v36, 0.0  ;;  %v1972_v39 = vadd.f32 %v510_v37, %v432_v34  ;;  %v1467_v36 = vld [vmem:[%s2350_s4 + $0x248] sm:$0xff] }
  0xe0   : > { %v514_v40 = vpop.f32.mrf.mxu0  ;;  %v1499_v37 = vld [vmem:[%s2350_s4 + $0x348] sm:$0xff] }
  0xe1   : > { %523 = vst [vmem:[%s394_s22] sm:$0xff] %v519_v38  ;;  %v520_v41 = vmax.f32 %v1972_v39, 0.0  ;;  %v515_v42 = vadd.f32 %v514_v40, %v428_v33  ;;  %v1501_v33 = vld [vmem:[%s2350_s4 + $0x358] sm:$0xff]  ;;  %v1466_v38 = vld [vmem:[%s2350_s4 + $0x240] sm:$0xff] }
  0xe2   : > { %v516_v43 = vpop.f32.mrf.mxu0  ;;  %v1498_v40 = vld [vmem:[%s2350_s4 + $0x340] sm:$0xff]  ;;  %v1549_v39 = vld [vmem:[%s2350_s4 + $0x4d8] sm:$0xff] }
  0xe3   : > { %527 = vst [vmem:[#allocation2 + $0x2] sm:$0xff] %v520_v41  ;;  %v521_v44 = vmax.f32 %v515_v42, 0.0  ;;  %v1977_v45 = vadd.f32 %v516_v43, %v432_v34  ;;  %v1468_v34 = vld [vmem:[%s2350_s4 + $0x250] sm:$0xff]  ;;  %v2122_v42 = vpop.permute.xlu0 %1130  ;;  %v1465_v43 = vld [vmem:[%s2350_s4 + $0x238] sm:$0xff] }
  0xe5   : > { %524 = vst [vmem:[%s394_s22 + $0x8] sm:$0xff] %v521_v44  ;;  %v522_v46 = vmax.f32 %v1977_v45, 0.0  ;;  %v1497_v44 = vld [vmem:[%s2350_s4 + $0x338] sm:$0xff] }
  0xe7   : > { %528 = vst [vmem:[#allocation2 + $0xa] sm:$0xff] %v522_v46 }
  0xea   : > { %v563_v50 = vld [vmem:[#allocation2 + $0x1] sm:$0xff] }
  0xeb   : > { %v529_v51 = vld [vmem:[#allocation2] sm:$0xff]  ;;  %663 = vmatmul.mubr.f32.vlgmr.msra.gmra.mxu1 %v563_v50  ;;  %v1463_v50 = vld [vmem:[%s2350_s4 + $0x228] sm:$0xff] }
  0xec   : > { %740 = vmatmul.mubr.f32.vlgmr.msra.gmra.mxu0 %v529_v51  ;;  %788 = vmatpush1.msra.mxu1 %v1488_v47  ;;  %v2130_v47 = vpop.permute.xlu1 %1134  ;;  %v1495_v51 = vld [vmem:[%s2350_s4 + $0x328] sm:$0xff] }
  0xed   : > { %904 = vmatpush1.msra.mxu0 %v1520_v48  ;;  %789 = vmatprep.subr.mxu1 %v1487_v49  ;;  %v1464_v48 = vld [vmem:[%s2350_s4 + $0x230] sm:$0xff] }
  0xee   : > { %905 = vmatprep.subr.mxu0 %v1519_v52  ;;  %790 = vmatpush1.msra.mxu1 %v1486_v53  ;;  %v564_v57 = vld [vmem:[#allocation2 + $0x9] sm:$0xff]  ;;  %v1462_v52 = vld [vmem:[%s2350_s4 + $0x220] sm:$0xff] }
  0xef   : > { %906 = vmatpush1.msra.mxu0 %v1518_v54  ;;  %v530_v58 = vld [vmem:[#allocation2 + $0x8] sm:$0xff]  ;;  %668 = vmatprep.mubr.f32.mxu1 %v1612_v4  ;;  %v1496_v49 = vld [vmem:[%s2350_s4 + $0x330] sm:$0xff]  ;;  %v1494_v53 = vld [vmem:[%s2350_s4 + $0x320] sm:$0xff] }
  0xf0   : > { %745 = vmatprep.mubr.f32.mxu0 %v1612_v4  ;;  %791 = vmatprep.subr.mxu1 %v1485_v55  ;;  %v1461_v54 = vld [vmem:[%s2350_s4 + $0x218] sm:$0xff] }
  0xf1   : > { %907 = vmatprep.subr.mxu0 %v1517_v56  ;;  %669 = vmatmul.mubr.f32.gmra.mxu1 %v564_v57  ;;  %v1493_v55 = vld [vmem:[%s2350_s4 + $0x318] sm:$0xff]  ;;  %v1460_v56 = vld [vmem:[%s2350_s4 + $0x210] sm:$0xff] }
  0xf2   : > { %746 = vmatmul.mubr.f32.gmra.mxu0 %v530_v58  ;;  %792 = vmatpush1.msra.mxu1 %v1484_v59  ;;  %v1492_v57 = vld [vmem:[%s2350_s4 + $0x310] sm:$0xff]  ;;  %v1133_v58 = vpop.permute.xlu0 %1132  ;;  %v1459_v59 = vld [vmem:[%s2350_s4 + $0x208] sm:$0xff] }
  0xf3   : > { %908 = vmatpush1.msra.mxu0 %v1516_v60  ;;  %793 = vmatprep.subr.mxu1 %v1483_v61  ;;  %v1491_v60 = vld [vmem:[%s2350_s4 + $0x308] sm:$0xff]  ;;  %v1143_v61 = vpop.permute.xlu1 %1142 }
  0xf4   : > { %909 = vmatprep.subr.mxu0 %v1515_v62  ;;  %794 = vmatpush1.msra.mxu1 %v1482_v63  ;;  %v1458_v62 = vld [vmem:[%s2350_s4 + $0x200] sm:$0xff] }
  0xf5   : > { %910 = vmatpush1.msra.mxu0 %v1514_v0  ;;  %795 = vmatprep.subr.mxu1 %v1481_v1  ;;  %v1490_v63 = vld [vmem:[%s2350_s4 + $0x300] sm:$0xff]  ;;  %v1553_v0 = vld [vmem:[%s2350_s4 + $0x4f8] sm:$0xff]  ;;  %v1139_v1 = vmax.f32 %v1724_v13, %v2122_v42  ;;  %v1551_v13 = vld [vmem:[%s2350_s4 + $0x4e8] sm:$0xff] }
  0xf6   : > { %911 = vmatprep.subr.mxu0 %v1513_v2  ;;  %796 = vmatpush1.msra.mxu1 %v1480_v3  ;;  %v1140_v2 = vmax.f32 %v1742_v18, %v1133_v58  ;;  %v868_v3 = vld [vmem:[#allocation2 + $0x3] sm:$0xff]  ;;  %v1184_v18 = vld [vmem:[%s2352_s6 + $0x38] sm:$0xff] }
  0xf7   : > { %912 = vmatpush1.msra.mxu0 %v1512_v5  ;;  %797 = vmatprep.subr.mxu1 %v1479_v6  ;;  %v1552_v5 = vld [vmem:[%s2350_s4 + $0x4f0] sm:$0xff]  ;;  %v1141_v6 = vmax.f32 %v1726_v14, %v2130_v47  ;;  %v1550_v14 = vld [vmem:[%s2350_s4 + $0x4e0] sm:$0xff]  ;;  %v1178_v47 = vld [vmem:[%s2352_s6 + $0x8] sm:$0xff] }
  0xf8   : > { %913 = vmatprep.subr.mxu0 %v1511_v7  ;;  %798 = vmatpush1.msra.mxu1 %v1478_v8  ;;  %v1145_v7 = vpop.permute.xlu0 %1144  ;;  %v1147_v8 = vpop.permute.xlu1 %1146  ;;  %v1531_v58 = vld [vmem:[%s2350_s4 + $0x448] sm:$0xff] }
  0xf9   : > { %914 = vmatpush1.msra.mxu0 %v1510_v9  ;;  %799 = vmatprep.subr.mxu1 %v1477_v10  ;;  %v2205_v9 = vmax.f32 %v1140_v2, %v1145_v7  ;;  %v869_v10 = vld [vmem:[#allocation2 + $0xb] sm:$0xff] }
  0xfa   : > { %915 = vmatprep.subr.mxu0 %v1509_v11  ;;  %800 = vmatpush1.msra.mxu1 %v1476_v12  ;;  %v1548_v11 = vld [vmem:[%s2350_s4 + $0x4d0] sm:$0xff]  ;;  %v1153_v12 = vmax.f32 %v1141_v6, %v1147_v8  ;;  %v1523_v2 = vld [vmem:[%s2350_s4 + $0x408] sm:$0xff] }
  0xfb   : > { %916 = vmatpush1.msra.mxu0 %v1508_v15  ;;  %801 = vmatprep.subr.mxu1 %v1475_v16  ;;  %v1547_v15 = vld [vmem:[%s2350_s4 + $0x4c8] sm:$0xff]  ;;  %v1183_v16 = vld [vmem:[%s2352_s6 + $0x30] sm:$0xff]  ;;  %v1159_v45 = vrot.slane %v2205_v9, 1 }
  0xfc   : > { %917 = vmatprep.subr.mxu0 %v1507_v17  ;;  %802 = vmatpush1.msra.mxu1 %v1474_v19  ;;  %v1546_v17 = vld [vmem:[%s2350_s4 + $0x4c0] sm:$0xff]  ;;  %v1545_v19 = vld [vmem:[%s2350_s4 + $0x4b8] sm:$0xff]  ;;  %v985_v6 = vld [vmem:[#allocation2 + $0xc] sm:$0xff] }
  0xfd   : > { %918 = vmatpush1.msra.mxu0 %v1506_v20  ;;  %803 = vmatprep.subr.mxu1 %v1473_v21  ;;  %v1182_v21 = vld [vmem:[%s2352_s6 + $0x28] sm:$0xff] }
  0xfe   : > { %919 = vmatprep.subr.mxu0 %v1505_v22  ;;  %804 = vmatpush1.msra.mxu1 %v1472_v23  ;;  %v1161_v22 = vrot.slane %v1153_v12, 1  ;;  %v1543_v23 = vld [vmem:[%s2350_s4 + $0x4a8] sm:$0xff] }
  0xff   : > { %920 = vmatpush1.msra.mxu0 %v1504_v24  ;;  %805 = vmatprep.subr.mxu1 %v1471_v25  ;;  %v1181_v24 = vld [vmem:[%s2352_s6 + $0x20] sm:$0xff] }
 0x100   : > { %921 = vmatprep.subr.mxu0 %v1503_v26  ;;  %806 = vmatpush1.msra.mxu1 %v1470_v27  ;;  %v1542_v25 = vld [vmem:[%s2350_s4 + $0x4a0] sm:$0xff]  ;;  %v1541_v26 = vld [vmem:[%s2350_s4 + $0x498] sm:$0xff] }
 0x101   : > { %922 = vmatpush1.msra.mxu0 %v1502_v28  ;;  %807 = vmatprep.subr.mxu1 %v1469_v31  ;;  %v1169_v28 = vrot.slane %v2205_v9, 2  ;;  %v1180_v31 = vld [vmem:[%s2352_s6 + $0x18] sm:$0xff] }
 0x102   : > { %923 = vmatprep.subr.mxu0 %v1501_v33  ;;  %808 = vmatpush1.msra.mxu1 %v1468_v34  ;;  %v1540_v34 = vld [vmem:[%s2350_s4 + $0x490] sm:$0xff] }
 0x103   : > { %924 = vmatpush1.msra.mxu0 %v1500_v35  ;;  %809 = vmatprep.subr.mxu1 %v1467_v36  ;;  %v1162_v35 = vsel %vm1157_vm1, %v1159_v45, %v1161_v22  ;;  %v1171_v36 = vrot.slane %v1153_v12, 2 }
 0x104   : > { %925 = vmatprep.subr.mxu0 %v1499_v37  ;;  %810 = vmatpush1.msra.mxu1 %v1466_v38  ;;  %v1539_v37 = vld [vmem:[%s2350_s4 + $0x488] sm:$0xff]  ;;  %v1179_v38 = vld [vmem:[%s2352_s6 + $0x10] sm:$0xff] }
 0x105   : > { %926 = vmatpush1.msra.mxu0 %v1498_v40  ;;  %811 = vmatprep.subr.mxu1 %v1465_v43  ;;  %v1538_v40 = vld [vmem:[%s2350_s4 + $0x480] sm:$0xff]  ;;  %v1537_v43 = vld [vmem:[%s2350_s4 + $0x478] sm:$0xff] }
 0x106   : > { %927 = vmatprep.subr.mxu0 %v1497_v44  ;;  %812 = vmatpush1.msra.mxu1 %v1464_v48  ;;  %v1166_v44 = vmax.f32 %v2205_v9, %v1162_v35 }
 0x107   : > { %928 = vmatpush1.msra.mxu0 %v1496_v49  ;;  %813 = vmatprep.subr.mxu1 %v1463_v50  ;;  %v1536_v49 = vld [vmem:[%s2350_s4 + $0x470] sm:$0xff]  ;;  %v1172_v50 = vsel %vm1167_vm2, %v1169_v28, %v1171_v36 }
 0x108   : > { %929 = vmatprep.subr.mxu0 %v1495_v51  ;;  %814 = vmatpush1.msra.mxu1 %v1462_v52  ;;  %v1535_v51 = vld [vmem:[%s2350_s4 + $0x468] sm:$0xff]  ;;  %v1177_v52 = vld [vmem:[%s2352_s6] sm:$0xff] }
 0x109   : > { %930 = vmatpush1.msra.mxu0 %v1494_v53  ;;  %815 = vmatprep.subr.mxu1 %v1461_v54  ;;  %v1534_v53 = vld [vmem:[%s2350_s4 + $0x460] sm:$0xff] }
 0x10a   : > { %931 = vmatprep.subr.mxu0 %v1493_v55  ;;  %816 = vmatpush1.msra.mxu1 %v1460_v56  ;;  %v1176_v55 = vmax.f32 %v1166_v44, %v1172_v50  ;;  %v1533_v56 = vld [vmem:[%s2350_s4 + $0x458] sm:$0xff] }
 0x10b   : > { %932 = vmatpush1.msra.mxu0 %v1492_v57  ;;  %817 = vmatprep.subr.mxu1 %v1459_v59  ;;  %v1532_v57 = vld [vmem:[%s2350_s4 + $0x450] sm:$0xff]  ;;  %v1530_v59 = vld [vmem:[%s2350_s4 + $0x440] sm:$0xff] }
 0x10c   : > { %933 = vmatprep.subr.mxu0 %v1491_v60  ;;  %818 = vmatpush1.msra.mxu1 %v1458_v62  ;;  %v1529_v60 = vld [vmem:[%s2350_s4 + $0x438] sm:$0xff]  ;;  %v1527_v62 = vld [vmem:[%s2350_s4 + $0x428] sm:$0xff] }
 0x10d   : > { %851 = vmatprep.mubr.f32.mxu1 %v1612_v4  ;;  %934 = vmatpush1.msra.mxu0 %v1490_v63  ;;  %v1526_v63 = vld [vmem:[%s2350_s4 + $0x420] sm:$0xff] }
 0x10e   : > { %967 = vmatprep.mubr.f32.mxu0 %v1612_v4  ;;  %852 = vmatmul.mubr.f32.vlgmr.msra.gmra.mxu1 %v520_v41  ;;  %v2203_v41 = vmax.f32 %v1139_v1, %v1143_v61  ;;  %v1528_v61 = vld [vmem:[%s2350_s4 + $0x430] sm:$0xff] }
 0x10f   : > { %968 = vmatmul.mubr.f32.vlgmr.msra.gmra.mxu0 %v868_v3  ;;  %1019 = vmatprep.subr.mxu1 %v1553_v0  ;;  %v1525_v0 = vld [vmem:[%s2350_s4 + $0x418] sm:$0xff]  ;;  %v1524_v1 = vld [vmem:[%s2350_s4 + $0x410] sm:$0xff]  ;;  %v1522_v3 = vld [vmem:[%s2350_s4 + $0x400] sm:$0xff] }
 0x110   : > { %857 = vmatprep.mubr.f32.mxu1 %v1612_v4  ;;  %1020 = vmatpush1.msra.mxu1 %v1552_v5  ;;  %v1158_v20 = vrot.slane %v2203_v41, 1  ;;  %v1168_v27 = vrot.slane %v2203_v41, 2  ;;  %v984_v5 = vld [vmem:[#allocation2 + $0x4] sm:$0xff] }
 0x111   : > { %973 = vmatprep.mubr.f32.mxu0 %v1612_v4  ;;  %1021 = vmatprep.subr.mxu1 %v1551_v13 }
 0x112   : > { %1573 = vmatprep.subr.mxu0 %v1184_v18  ;;  %1022 = vmatpush1.msra.mxu1 %v1550_v14  ;;  %v1160_v33 = vsel %vm1157_vm1, %v1158_v20, %v1159_v45  ;;  %v1170_v48 = vsel %vm1167_vm2, %v1168_v27, %v1169_v28  ;;  %v1100_v27 = vld [vmem:[%s2351_s5] sm:$0x3] }
 0x113   : > { %974 = vmatmul.mubr.f32.gmra.mxu0 %v869_v10  ;;  %858 = vmatmul.mubr.f32.gmra.mxu1 %v522_v46  ;;  %v1544_v46 = vld [vmem:[%s2350_s4 + $0x4b0] sm:$0xff]  ;;  %v1165_v42 = vmax.f32 %v2203_v41, %v1160_v33  ;;  %v1109_v44 = vrot.slane %v1100_v27, %v431_v32 }
 0x114   : > { %1023 = vmatprep.subr.mxu1 %v1549_v39  ;;  %1574 = vmatpush3.msra.mxu0 %v1184_v18 }
 0x115   : > { %1024 = vmatpush1.msra.mxu1 %v1548_v11  ;;  %1575 = vmatprep.subr.mxu0 %v1183_v16  ;;  %v1175_v54 = vmax.f32 %v1165_v42, %v1170_v48 }
 0x116   : > { %1025 = vmatprep.subr.mxu1 %v1547_v15  ;;  %1576 = vmatpush3.msra.mxu0 %v1183_v16 }
 0x117   : > { %1026 = vmatpush1.msra.mxu1 %v1546_v17  ;;  %1577 = vmatprep.subr.mxu0 %v1182_v21 }
 0x118   : > { %1027 = vmatprep.subr.mxu1 %v1545_v19  ;;  %1578 = vmatpush3.msra.mxu0 %v1182_v21 }
 0x119   : > { %1028 = vmatpush1.msra.mxu1 %v1544_v46  ;;  %1579 = vmatprep.subr.mxu0 %v1181_v24 }
 0x11a   : > { %1029 = vmatprep.subr.mxu1 %v1543_v23  ;;  %1580 = vmatpush3.msra.mxu0 %v1181_v24 }
 0x11b   : > { %1030 = vmatpush1.msra.mxu1 %v1542_v25  ;;  %1581 = vmatprep.subr.mxu0 %v1180_v31 }
 0x11c   : > { %1031 = vmatprep.subr.mxu1 %v1541_v26  ;;  %1582 = vmatpush3.msra.mxu0 %v1180_v31 }
 0x11d   : > { %1032 = vmatpush1.msra.mxu1 %v1540_v34  ;;  %1583 = vmatprep.subr.mxu0 %v1179_v38 }
 0x11e   : > { %1033 = vmatprep.subr.mxu1 %v1539_v37  ;;  %1584 = vmatpush3.msra.mxu0 %v1179_v38  ;;  %v1105_v37 = vrot.slane %v1100_v27, %v427_v30 }
 0x11f   : > { %1034 = vmatpush1.msra.mxu1 %v1538_v40  ;;  %1585 = vmatprep.subr.mxu0 %v1178_v47 }
 0x120   : > { %1035 = vmatprep.subr.mxu1 %v1537_v43  ;;  %1586 = vmatpush3.msra.mxu0 %v1178_v47 }
 0x121   : > { %1036 = vmatpush1.msra.mxu1 %v1536_v49  ;;  %1587 = vmatprep.subr.mxu0 %v1177_v52 }
 0x122   : > { %1037 = vmatprep.subr.mxu1 %v1535_v51  ;;  %1588 = vmatpush3.msra.mxu0 %v1177_v52 }
 0x123   : > { %1038 = vmatpush1.msra.mxu1 %v1534_v53  ;;  %1589 = vmatprep.mubr.msk.f32.mxu0 %vm435_vm0, %v1175_v54 }
 0x124   : > { %1039 = vmatprep.subr.mxu1 %v1533_v56  ;;  %1590 = vmatmul.mubr.msk.f32.vlgmr.msra.gmra.mxu0 %vm435_vm0, %v1176_v55 }
 0x125   : > { %1040 = vmatpush1.msra.mxu1 %v1532_v57  ;;  %1083 = vmatprep.mubr.f32.mxu1 %v1612_v4 }
 0x126   : > { %1041 = vmatprep.subr.mxu1 %v1531_v58 }
 0x127   : > { %1042 = vmatpush1.msra.mxu1 %v1530_v59 }
 0x128   : > { %1043 = vmatprep.subr.mxu1 %v1529_v60 }
 0x129   : > { %1044 = vmatpush1.msra.mxu1 %v1528_v61 }
 0x12a   : > { %1045 = vmatprep.subr.mxu1 %v1527_v62 }
 0x12b   : > { %1046 = vmatpush1.msra.mxu1 %v1526_v63 }
 0x12c   : > { %1047 = vmatprep.subr.mxu1 %v1525_v0 }
 0x12d   : > { %1048 = vmatpush1.msra.mxu1 %v1524_v1 }
 0x12e   : > { %1049 = vmatprep.subr.mxu1 %v1523_v2 }
 0x12f   : > { %1050 = vmatpush1.msra.mxu1 %v1522_v3 }
 0x130   : > { %1084 = vmatmul.mubr.f32.vlgmr.msra.gmra.mxu1 %v984_v5 }
 0x131   : > { %1089 = vmatprep.mubr.f32.mxu1 %v1612_v4  ;;  %v1554_v4 = vld [vmem:[%s2353_s7] ss:$0 sm:$0xff] }
 0x134   : > { %1090 = vmatmul.mubr.f32.gmra.mxu1 %v985_v6 }
 0x1ab   : > { %v664_v8 = vpop.f32.mrf.mxu1 }
 0x1ac   : > { %v741_v7 = vpop.f32.mrf.mxu0 }
 0x1ad   : > { %v666_v41 = vpop.f32.mrf.mxu1  ;;  %v742_v22 = vadd.f32 %v741_v7, %v664_v8 }
 0x1ae   : > { %v743_v13 = vpop.f32.mrf.mxu0 }
 0x1af   : > { %v744_v25 = vadd.f32 %v743_v13, %v666_v41 }
 0x1b1   : > { %v670_v10 = vpop.f32.mrf.mxu1 }
 0x1b2   : > { %v747_v18 = vpop.f32.mrf.mxu0 }
 0x1b3   : > { %v672_v12 = vpop.f32.mrf.mxu1  ;;  %v748_v28 = vadd.f32 %v747_v18, %v670_v10 }
 0x1b4   : > { %v749_v14 = vpop.f32.mrf.mxu0 }
 0x1b5   : > { %v750_v34 = vadd.f32 %v749_v14, %v672_v12 }
 0x1ce   : > { %v853_v15 = vpop.f32.mrf.mxu1 }
 0x1cf   : > { %v969_v39 = vpop.f32.mrf.mxu0  ;;  %v864_v26 = vadd.f32 %v853_v15, %v742_v22 }
 0x1d0   : > { %v855_v19 = vpop.f32.mrf.mxu1 }
 0x1d1   : > { %v971_v9 = vpop.f32.mrf.mxu0  ;;  %v865_v31 = vadd.f32 %v855_v19, %v744_v25  ;;  %v980_v35 = vadd.f32 %v969_v39, %v864_v26 }
 0x1d3   : > { %v975_v11 = vpop.f32.mrf.mxu0  ;;  %v859_v23 = vpop.f32.mrf.mxu1  ;;  %v981_v40 = vadd.f32 %v971_v9, %v865_v31 }
 0x1d4   : > { %v866_v36 = vadd.f32 %v859_v23, %v748_v28 }
 0x1d5   : > { %v977_v16 = vpop.f32.mrf.mxu0  ;;  %v861_v33 = vpop.f32.mrf.mxu1 }
 0x1d6   : > { %v867_v42 = vadd.f32 %v861_v33, %v750_v34  ;;  %v982_v48 = vadd.f32 %v975_v11, %v866_v36 }
 0x1d8   : > { %v983_v52 = vadd.f32 %v977_v16, %v867_v42 }
 0x1e4   : > { %v1591_v17 = vpop.f32.mrf.mxu0 }
 0x1e5   : > { %v1270_v20 = vadd.f32 %v1591_v17, %v1554_v4 }
 0x1e6   : > { %v1264_v21 = vpop.f32.mrf.mxu0 }
 0x1e7   : > { %v1274_v45 = vmax.f32 %v1270_v20, 0.0  ;;  %v1265_v46 = vadd.f32 %v1554_v4, %v1264_v21 }
 0x1e9   : > { %1276 = vst [vmem:[%s404_s29 + $0x8] sm:$0xff] %v1274_v45  ;;  %v1273_v24 = vmax.f32 %v1265_v46, 0.0 }
 0x1eb   : > { %1275 = vst [vmem:[%s404_s29] sm:$0xff] %v1273_v24 }
 0x1f0   : > { %v1085_v38 = vpop.f32.mrf.mxu1 }
 0x1f1   : > { %v1096_v43 = vadd.f32 %v1085_v38, %v980_v35 }
 0x1f2   : > { %v1087_v47 = vpop.f32.mrf.mxu1 }
 0x1f3   : > { %v1112_v49 = vadd.f32 %v1105_v37, %v1096_v43  ;;  %v1097_v50 = vadd.f32 %v1087_v47, %v981_v40 }
 0x1f4   : > { %v1091_v51 = vpop.f32.mrf.mxu1 }
 0x1f5   : > { %v1116_v53 = vmax.f32 %v1112_v49, 0.0  ;;  %v1113_v30 = vadd.f32 %v1109_v44, %v1097_v50  ;;  %v1098_v54 = vadd.f32 %v1091_v51, %v982_v48 }
 0x1f6   : > { %v1093_v55 = vpop.f32.mrf.mxu1 }
 0x1f7   : > { %1120 = vst [vmem:[%s399_s16] sm:$0xff] %v1116_v53  ;;  %v1117_v56 = vmax.f32 %v1113_v30, 0.0  ;;  %v1114_v57 = vadd.f32 %v1105_v37, %v1098_v54  ;;  %v1099_v58 = vadd.f32 %v1093_v55, %v983_v52 }
 0x1f9   : > { %1121 = vst [vmem:[%s399_s16 + $0x8] sm:$0xff] %v1117_v56  ;;  %v1118_v29 = vmax.f32 %v1114_v57, 0.0  ;;  %v1115_v32 = vadd.f32 %v1109_v44, %v1099_v58 }
 0x1fb   : > { %1122 = vst [vmem:[%s399_s16 + $0x10] sm:$0xff] %v1118_v29  ;;  %v1119_v59 = vmax.f32 %v1115_v32, 0.0 }
 0x1fd   : > { %1123 = vst [vmem:[%s399_s16 + $0x18] sm:$0xff] %v1119_v59 }
 0x1fe PF: > { %s21_s13 = sadd.s32 1, %s1610_s13  }
 0x1ff   : > { %p18_p4 = scmp.ge.s32.totalorder %s21_s13, 4  }
 0x201   :  { %20 = sbr.rel (!%p18_p4) target bundleno = 1 (0x1), region = 113 }

</bundles_post_ra>
